<compile_context>
chip_gen: v6e
topology: v6e:2x2x1
jax: 0.10.0
libtpu: 0.0.40
codegen_flags: <defaults>
</compile_context>

<pallas_src>
import functools

import jax
import jax.numpy as jnp
from jax.experimental import pallas as pl
from jax.experimental.pallas import tpu as pltpu

EPS = 1e-5  # nn.BatchNorm2d default eps


def _round_up(x, m):
    return (x + m - 1) // m * m


# ----------------------------- in-kernel helpers -----------------------------


def _col_masks(cin, H, W):
    """Column-validity masks for the left (dx==0) / right (dx==2) taps."""
    col = jax.lax.broadcasted_iota(jnp.int32, (cin, H * W), 1) % W
    return col >= 1, col <= W - 2


def _fill_padded(pad_ref, img, pad):
    """Write img (C, H*W) into the interior of the zero-winged flat scratch."""
    c, hw = img.shape
    zeros = jnp.zeros((c, pad), pad_ref.dtype)
    pad_ref[:, 0:pad] = zeros
    pad_ref[:, pad + hw:pad + hw + pad] = zeros
    pad_ref[:, pad:pad + hw] = img.astype(pad_ref.dtype)


def _conv3x3_from_padded(pad_ref, w_ref, mask_l, mask_r, *, H, W, pad):
    """3x3 'same' conv (stride 1) on one image held as a flat padded buffer.

    pad_ref: (Cin, pad + H*W + pad) scratch; interior holds the image in
             h*W + w order, wings are zero.
    w_ref:   (9, Cout, Cin) resident weights, tap index = dy*3 + dx.
    Returns (Cout, H*W) f32, accumulated in registers (single store by caller).
    """
    HW = H * W
    acc = None
    for dy in range(3):
        for dx in range(3):
            off = pad + (dy - 1) * W + (dx - 1)   # static lane offset
            xt = pad_ref[:, off:off + HW]         # (Cin, H*W)
            if dx == 0:
                xt = jnp.where(mask_l, xt, jnp.zeros_like(xt))
            elif dx == 2:
                xt = jnp.where(mask_r, xt, jnp.zeros_like(xt))
            contrib = jnp.dot(w_ref[dy * 3 + dx], xt,
                              preferred_element_type=jnp.float32)
            acc = contrib if acc is None else acc + contrib
    return acc


# --------------------------------- kernels -----------------------------------


def conv1_stats_kernel(x_ref, w_ref, y_ref, s_ref, sq_ref, pad_ref,
                       *, H, W, pad):
    """conv1 (bias dropped; cancelled by BN) + per-image sum / sum-of-squares."""
    mask_l, mask_r = _col_masks(x_ref.shape[0], H, W)
    _fill_padded(pad_ref, x_ref[...], pad)
    y = _conv3x3_from_padded(pad_ref, w_ref, mask_l, mask_r, H=H, W=W, pad=pad)
    y_ref[...] = y
    s_ref[...] = jnp.sum(y, axis=1, keepdims=True)
    sq_ref[...] = jnp.sum(y * y, axis=1, keepdims=True)


def bn_relu_conv2_stats_kernel(y1_ref, a_ref, b_ref, w_ref,
                               y_ref, s_ref, sq_ref, pad_ref, *, H, W, pad):
    """Fused bn1-affine + ReLU + conv2 + per-image sum / sum-of-squares."""
    h = jnp.maximum(y1_ref[...] * a_ref[...] + b_ref[...], 0.0)  # f32
    mask_l, mask_r = _col_masks(y1_ref.shape[0], H, W)
    _fill_padded(pad_ref, h, pad)
    y = _conv3x3_from_padded(pad_ref, w_ref, mask_l, mask_r, H=H, W=W, pad=pad)
    y_ref[...] = y
    s_ref[...] = jnp.sum(y, axis=1, keepdims=True)
    sq_ref[...] = jnp.sum(y * y, axis=1, keepdims=True)


# --------------------------------- wrapper ------------------------------------


def _finalize_bn(s, sq, gamma, beta, count):
    """Fold training-mode BN stats into a per-channel affine: bn(x) = a*x + b."""
    s_tot = jnp.sum(s[:, :, 0], axis=0)      # (C,)
    sq_tot = jnp.sum(sq[:, :, 0], axis=0)    # (C,)
    mean = s_tot / count
    # TODO(synk): single-pass E[x^2]-E[x]^2 in f32 is fine at these magnitudes;
    # switch to a shifted/Welford accumulation if activations can be large.
    var = sq_tot / count - mean * mean       # biased batch variance
    a = gamma * jax.lax.rsqrt(var + EPS)
    b = beta - mean * a
    return a.reshape(-1, 1), b.reshape(-1, 1)   # (C, 1) for (C, H*W) tiles


def _vmem_limit_bytes(*nbytes):
    # Explicit scoped-VMEM budget: double-buffered blocks + 2x headroom,
    # clamped to [4 MiB, 32 MiB] (safe on v5e/v6e/v7x scoped limits).
    est = 4 * sum(int(b) for b in nbytes)
    return int(min(max(est, 4 << 20), 32 << 20))


def residual_block_forward(x_nchw, params, *, mxu_dtype=jnp.float32):
    """Forward pass of ResidualBlock(in_ch == out_ch, stride == 1).

    mxu_dtype: dtype of the conv MXU operands (weights + shifted patches).
      jnp.float32  -> exact parity with the f32 PyTorch reference.
      jnp.bfloat16 -> full-rate MXU on v6e/v7x (elementwise math stays f32).
    """
    N, C, H, W = x_nchw.shape
    Cout = params["w1"].shape[0]
    # TODO(synk): stride != 1 (downsampling conv shortcut) not implemented;
    #             this covers the default stride=1 / identity-shortcut path.
    assert params["w1"].shape[1] == C and Cout == C
    HW = H * W
    pad = max(128, _round_up(W + 1, 128))   # zero wing, keeps interior aligned
    pad_lanes = pad + HW + pad
    w_bytes = jnp.dtype(mxu_dtype).itemsize

    x_flat = x_nchw.reshape(N, C, HW).astype(jnp.float32)   # free reshape

    def prep_w(w_oihw):
        # OIHW -> (3, 3, Cout, Cin) -> (9, Cout, Cin); tap index = dy*3 + dx.
        cout, cin = w_oihw.shape[0], w_oihw.shape[1]
        return jnp.transpose(w_oihw, (2, 3, 0, 1)).reshape(9, cout, cin).astype(mxu_dtype)

    w1 = prep_w(params["w1"])
    w2 = prep_w(params["w2"])
    count = float(N * HW)

    def img_spec(ch):     # one lane-dense (C, H*W) image tile per grid step
        return pl.BlockSpec((None, ch, HW), lambda n: (n, 0, 0))

    def stat_spec(ch):    # per-image (C, 1) partial statistics
        return pl.BlockSpec((None, ch, 1), lambda n: (n, 0, 0))

    def const_spec(shape):  # full-array block, same every step -> VMEM resident
        return pl.BlockSpec(shape, lambda n, _r=len(shape): (0,) * _r)

    # --- stage A: conv1 + per-image sum / sumsq ------------------------------
    bytes_a = (C * HW * 4, Cout * HW * 4, 9 * Cout * C * w_bytes,
               C * pad_lanes * w_bytes)
    kA = functools.partial(conv1_stats_kernel, H=H, W=W, pad=pad)
    y1, s1, sq1 = pl.pallas_call(
        kA,
        grid=(N,),
        in_specs=[img_spec(C), const_spec((9, Cout, C))],
        out_specs=[img_spec(Cout), stat_spec(Cout), stat_spec(Cout)],
        out_shape=[
            jax.ShapeDtypeStruct((N, Cout, HW), jnp.float32),
            jax.ShapeDtypeStruct((N, Cout, 1), jnp.float32),
            jax.ShapeDtypeStruct((N, Cout, 1), jnp.float32),
        ],
        scratch_shapes=[pltpu.VMEM((C, pad_lanes), mxu_dtype)],
        compiler_params=pltpu.CompilerParams(
            dimension_semantics=("parallel",),
            vmem_limit_bytes=_vmem_limit_bytes(*bytes_a)),
    )(x_flat, w1)

    a1, b1 = _finalize_bn(s1, sq1, params["g1"], params["be1"], count)

    # --- stage B: bn1-affine + relu + conv2 + per-image sum / sumsq ----------
    bytes_b = (2 * Cout * HW * 4, 9 * Cout * Cout * w_bytes,
               Cout * pad_lanes * w_bytes)
    kB = functools.partial(bn_relu_conv2_stats_kernel, H=H, W=W, pad=pad)
    y2, s2, sq2 = pl.pallas_call(
        kB,
        grid=(N,),
        in_specs=[img_spec(Cout), const_spec((Cout, 1)), const_spec((Cout, 1)),
                  const_spec((9, Cout, Cout))],
        out_specs=[img_spec(Cout), stat_spec(Cout), stat_spec(Cout)],
        out_shape=[
            jax.ShapeDtypeStruct((N, Cout, HW), jnp.float32),
            jax.ShapeDtypeStruct((N, Cout, 1), jnp.float32),
            jax.ShapeDtypeStruct((N, Cout, 1), jnp.float32),
        ],
        scratch_shapes=[pltpu.VMEM((Cout, pad_lanes), mxu_dtype)],
        compiler_params=pltpu.CompilerParams(
            dimension_semantics=("parallel",),
            vmem_limit_bytes=_vmem_limit_bytes(*bytes_b)),
    )(y1, a1, b1, w2)

    a2, b2 = _finalize_bn(s2, sq2, params["g2"], params["be2"], count)

    # --- stage C (XLA): bn2 affine + residual add; single fused HBM pass,
    #     output is already in NCHW element order (reshape is free).
    out = y2 * a2[None, :, :] + b2[None, :, :] + x_flat
    return out.reshape(N, C, H, W)


# -------------------------------- reference -----------------------------------


def reference_forward(x_nchw, params):
    """Pure-XLA reference matching the PyTorch module (training-mode BN)."""
    x = x_nchw.astype(jnp.float32)

    def conv(h, w_oihw, b):
        y = jax.lax.conv_general_dilated(
            h, w_oihw, window_strides=(1, 1), padding="SAME",
            dimension_numbers=("NCHW", "OIHW", "NCHW"),
            precision=jax.lax.Precision.HIGHEST)
        return y + b.reshape(1, -1, 1, 1)

    def bn(h, g, be):
        m = jnp.mean(h, axis=(0, 2, 3), keepdims=True)
        v = jnp.mean((h - m) ** 2, axis=(0, 2, 3), keepdims=True)
        return ((h - m) * jax.lax.rsqrt(v + EPS) * g.reshape(1, -1, 1, 1)
                + be.reshape(1, -1, 1, 1))

    h = jnp.maximum(bn(conv(x, params["w1"], params["b1"]),
                       params["g1"], params["be1"]), 0.0)
    out = bn(conv(h, params["w2"], params["b2"]),
             params["g2"], params["be2"]) + x
    return out


# ----------------------------------- main --------------------------------------


if __name__ == "__main__":
    N, C, H, W = 2, 4, 16, 16  # in_channels == out_channels, stride = 1
    key = jax.random.PRNGKey(0)
    ks = jax.random.split(key, 9)

    params = {
        "w1": 0.1 * jax.random.normal(ks[0], (C, C, 3, 3), jnp.float32),
        "b1": 0.1 * jax.random.normal(ks[1], (C,), jnp.float32),
        "g1": 1.0 + 0.1 * jax.random.normal(ks[2], (C,), jnp.float32),
        "be1": 0.1 * jax.random.normal(ks[3], (C,), jnp.float32),
        "w2": 0.1 * jax.random.normal(ks[4], (C, C, 3, 3), jnp.float32),
        "b2": 0.1 * jax.random.normal(ks[5], (C,), jnp.float32),
        "g2": 1.0 + 0.1 * jax.random.normal(ks[6], (C,), jnp.float32),
        "be2": 0.1 * jax.random.normal(ks[7], (C,), jnp.float32),
    }
    x = jax.random.normal(ks[8], (N, C, H, W), jnp.float32)

    ref = jax.block_until_ready(reference_forward(x, params))

    # Exact-parity path (f32 MXU operands).
    fwd_f32 = jax.jit(functools.partial(residual_block_forward,
                                        mxu_dtype=jnp.float32))
    out = jax.block_until_ready(fwd_f32(x, params))
    assert out.shape == (N, C, H, W), out.shape
    err = float(jnp.max(jnp.abs(out - ref)))
    if err > 2e-4:
        raise AssertionError(f"f32 path mismatch vs reference, max abs err = {err}")

    # v6e/v7x fast path: bf16 MXU operands, f32 elementwise / accumulation.
    fwd_bf16 = jax.jit(functools.partial(residual_block_forward,
                                         mxu_dtype=jnp.bfloat16))
    out16 = jax.block_until_ready(fwd_bf16(x, params))
    err16 = float(jnp.max(jnp.abs(out16 - ref)))
    if err16 > 0.2:
        raise AssertionError(f"bf16 path mismatch vs reference, max abs err = {err16}")

    print("KERNEL_OK")
</pallas_src>

<mosaic_0001>
module attributes {stable_mosaic.version = 11 : i64} {
  func.func @conv1_stats_kernel(%arg0: i32, %arg1: memref<1x4x256xf32, #tpu.memory_space<vmem>>, %arg2: memref<9x4x4xf32, #tpu.memory_space<vmem>>, %arg3: memref<1x4x256xf32, #tpu.memory_space<vmem>>, %arg4: memref<1x4x1xf32, #tpu.memory_space<vmem>>, %arg5: memref<1x4x1xf32, #tpu.memory_space<vmem>>, %arg6: memref<4x512xf32, #tpu.memory_space<vmem>>) attributes {dimension_semantics = [#tpu.dimension_semantics<parallel>], iteration_bounds = array<i64: 2>, scalar_prefetch = 0 : i64, scratch_operands = 1 : i64, tpu.core_type = #tpu.core_type<tc>, window_params = [{transform_indices = @transform_0, window_bounds = array<i64: 1, 4, 256>}, {pipeline_mode = #tpu.pipeline_mode<synchronous>, transform_indices = @transform_1, window_bounds = array<i64: 9, 4, 4>}, {transform_indices = @transform_2, window_bounds = array<i64: 1, 4, 256>}, {transform_indices = @transform_3, window_bounds = array<i64: 1, 4, 1>}, {transform_indices = @transform_4, window_bounds = array<i64: 1, 4, 1>}]} {
    %0 = tpu.iota {dimensions = array<i32: 1>} : vector<4x256xi32>
    %c16_i32 = arith.constant 16 : i32
    %c0_i32 = arith.constant 0 : i32
    %1 = arith.cmpi eq, %c16_i32, %c0_i32 : i32
    %c1_i32 = arith.constant 1 : i32
    %2 = arith.select %1, %c1_i32, %c16_i32 : i32
    %3 = vector.broadcast %2 : i32 to vector<4x256xi32>
    %4 = arith.remsi %0, %3 : vector<4x256xi32>
    %c0_i32_0 = arith.constant 0 : i32
    %5 = vector.broadcast %c0_i32_0 : i32 to vector<4x256xi32>
    %6 = arith.cmpi ne, %4, %5 : vector<4x256xi32>
    %c0_i32_1 = arith.constant 0 : i32
    %7 = vector.broadcast %c0_i32_1 : i32 to vector<4x256xi32>
    %8 = arith.cmpi slt, %4, %7 : vector<4x256xi32>
    %c0_i32_2 = arith.constant 0 : i32
    %9 = arith.cmpi slt, %2, %c0_i32_2 : i32
    %10 = vector.broadcast %9 : i1 to vector<4x256xi1>
    %11 = vector.broadcast %10 : vector<4x256xi1> to vector<4x256xi1>
    %12 = arith.xori %8, %11 : vector<4x256xi1>
    %13 = arith.andi %12, %6 : vector<4x256xi1>
    %14 = vector.broadcast %2 : i32 to vector<4x256xi32>
    %15 = arith.addi %4, %14 : vector<4x256xi32>
    %16 = arith.select %13, %15, %4 : vector<4x256xi1>, vector<4x256xi32>
    %c1_i32_3 = arith.constant 1 : i32
    %17 = vector.broadcast %c1_i32_3 : i32 to vector<4x256xi32>
    %18 = arith.cmpi sge, %16, %17 : vector<4x256xi32>
    %c14_i32 = arith.constant 14 : i32
    %19 = vector.broadcast %c14_i32 : i32 to vector<4x256xi32>
    %20 = arith.cmpi sle, %16, %19 : vector<4x256xi32>
    %c0 = arith.constant 0 : index
    %c0_4 = arith.constant 0 : index
    %c0_5 = arith.constant 0 : index
    %21 = vector.load %arg1[%c0, %c0_4, %c0_5] : memref<1x4x256xf32, #tpu.memory_space<vmem>>, vector<1x4x256xf32>
    %22 = vector.shape_cast %21 : vector<1x4x256xf32> to vector<4x256xf32>
    %cst = arith.constant 0.000000e+00 : f32
    %23 = vector.broadcast %cst : f32 to vector<4x128xf32>
    %c0_6 = arith.constant 0 : index
    %c0_7 = arith.constant 0 : index
    %24 = vector.load %arg6[%c0_6, %c0_7] : memref<4x512xf32, #tpu.memory_space<vmem>>, vector<4x128xf32>
    tpu.vector_store %arg6[%c0_6, %c0_7], %23 {strides = array<i32>} : memref<4x512xf32, #tpu.memory_space<vmem>>, vector<4x128xf32>,
    %c0_8 = arith.constant 0 : index
    %c384 = arith.constant 384 : index
    %25 = vector.load %arg6[%c0_8, %c384] : memref<4x512xf32, #tpu.memory_space<vmem>>, vector<4x128xf32>
    tpu.vector_store %arg6[%c0_8, %c384], %23 {strides = array<i32>} : memref<4x512xf32, #tpu.memory_space<vmem>>, vector<4x128xf32>,
    %c0_9 = arith.constant 0 : index
    %c128 = arith.constant 128 : index
    %26 = vector.load %arg6[%c0_9, %c128] : memref<4x512xf32, #tpu.memory_space<vmem>>, vector<4x256xf32>
    tpu.vector_store %arg6[%c0_9, %c128], %22 {strides = array<i32>} : memref<4x512xf32, #tpu.memory_space<vmem>>, vector<4x256xf32>,
    %c0_10 = arith.constant 0 : index
    %c111 = arith.constant 111 : index
    %27 = vector.load %arg6[%c0_10, %c111] : memref<4x512xf32, #tpu.memory_space<vmem>>, vector<4x256xf32>
    %cst_11 = arith.constant 0.000000e+00 : f32
    %28 = vector.broadcast %cst_11 : f32 to vector<4x256xf32>
    %29 = arith.select %18, %27, %28 : vector<4x256xi1>, vector<4x256xf32>
    %c0_12 = arith.constant 0 : index
    %c0_13 = arith.constant 0 : index
    %c0_14 = arith.constant 0 : index
    %30 = vector.load %arg2[%c0_12, %c0_13, %c0_14] : memref<9x4x4xf32, #tpu.memory_space<vmem>>, vector<1x4x4xf32>
    %31 = vector.shape_cast %30 : vector<1x4x4xf32> to vector<4x4xf32>
    %cst_15 = arith.constant dense<0.000000e+00> : vector<4x256xf32>
    %32 = tpu.matmul %31, %29, %cst_15 {dimension_numbers = #tpu.dot_dimension_numbers<[1], [0], [0], [1], [0, 0, 1, 1], [], []>} : vector<4x4xf32>, vector<4x256xf32>, vector<4x256xf32> -> vector<4x256xf32>
    %c0_16 = arith.constant 0 : index
    %c112 = arith.constant 112 : index
    %33 = vector.load %arg6[%c0_16, %c112] : memref<4x512xf32, #tpu.memory_space<vmem>>, vector<4x256xf32>
    %c1 = arith.constant 1 : index
    %c0_17 = arith.constant 0 : index
    %c0_18 = arith.constant 0 : index
    %34 = vector.load %arg2[%c1, %c0_17, %c0_18] : memref<9x4x4xf32, #tpu.memory_space<vmem>>, vector<1x4x4xf32>
    %35 = vector.shape_cast %34 : vector<1x4x4xf32> to vector<4x4xf32>
    %cst_19 = arith.constant dense<0.000000e+00> : vector<4x256xf32>
    %36 = tpu.matmul %35, %33, %cst_19 {dimension_numbers = #tpu.dot_dimension_numbers<[1], [0], [0], [1], [0, 0, 1, 1], [], []>} : vector<4x4xf32>, vector<4x256xf32>, vector<4x256xf32> -> vector<4x256xf32>
    %37 = arith.addf %32, %36 : vector<4x256xf32>
    %c0_20 = arith.constant 0 : index
    %c113 = arith.constant 113 : index
    %38 = vector.load %arg6[%c0_20, %c113] : memref<4x512xf32, #tpu.memory_space<vmem>>, vector<4x256xf32>
    %cst_21 = arith.constant 0.000000e+00 : f32
    %39 = vector.broadcast %cst_21 : f32 to vector<4x256xf32>
    %40 = arith.select %20, %38, %39 : vector<4x256xi1>, vector<4x256xf32>
    %c2 = arith.constant 2 : index
    %c0_22 = arith.constant 0 : index
    %c0_23 = arith.constant 0 : index
    %41 = vector.load %arg2[%c2, %c0_22, %c0_23] : memref<9x4x4xf32, #tpu.memory_space<vmem>>, vector<1x4x4xf32>
    %42 = vector.shape_cast %41 : vector<1x4x4xf32> to vector<4x4xf32>
    %cst_24 = arith.constant dense<0.000000e+00> : vector<4x256xf32>
    %43 = tpu.matmul %42, %40, %cst_24 {dimension_numbers = #tpu.dot_dimension_numbers<[1], [0], [0], [1], [0, 0, 1, 1], [], []>} : vector<4x4xf32>, vector<4x256xf32>, vector<4x256xf32> -> vector<4x256xf32>
    %44 = arith.addf %37, %43 : vector<4x256xf32>
    %c0_25 = arith.constant 0 : index
    %c127 = arith.constant 127 : index
    %45 = vector.load %arg6[%c0_25, %c127] : memref<4x512xf32, #tpu.memory_space<vmem>>, vector<4x256xf32>
    %cst_26 = arith.constant 0.000000e+00 : f32
    %46 = vector.broadcast %cst_26 : f32 to vector<4x256xf32>
    %47 = arith.select %18, %45, %46 : vector<4x256xi1>, vector<4x256xf32>
    %c3 = arith.constant 3 : index
    %c0_27 = arith.constant 0 : index
    %c0_28 = arith.constant 0 : index
    %48 = vector.load %arg2[%c3, %c0_27, %c0_28] : memref<9x4x4xf32, #tpu.memory_space<vmem>>, vector<1x4x4xf32>
    %49 = vector.shape_cast %48 : vector<1x4x4xf32> to vector<4x4xf32>
    %cst_29 = arith.constant dense<0.000000e+00> : vector<4x256xf32>
    %50 = tpu.matmul %49, %47, %cst_29 {dimension_numbers = #tpu.dot_dimension_numbers<[1], [0], [0], [1], [0, 0, 1, 1], [], []>} : vector<4x4xf32>, vector<4x256xf32>, vector<4x256xf32> -> vector<4x256xf32>
    %51 = arith.addf %44, %50 : vector<4x256xf32>
    %c0_30 = arith.constant 0 : index
    %c128_31 = arith.constant 128 : index
    %52 = vector.load %arg6[%c0_30, %c128_31] : memref<4x512xf32, #tpu.memory_space<vmem>>, vector<4x256xf32>
    %c4 = arith.constant 4 : index
    %c0_32 = arith.constant 0 : index
    %c0_33 = arith.constant 0 : index
    %53 = vector.load %arg2[%c4, %c0_32, %c0_33] : memref<9x4x4xf32, #tpu.memory_space<vmem>>, vector<1x4x4xf32>
    %54 = vector.shape_cast %53 : vector<1x4x4xf32> to vector<4x4xf32>
    %cst_34 = arith.constant dense<0.000000e+00> : vector<4x256xf32>
    %55 = tpu.matmul %54, %52, %cst_34 {dimension_numbers = #tpu.dot_dimension_numbers<[1], [0], [0], [1], [0, 0, 1, 1], [], []>} : vector<4x4xf32>, vector<4x256xf32>, vector<4x256xf32> -> vector<4x256xf32>
    %56 = arith.addf %51, %55 : vector<4x256xf32>
    %c0_35 = arith.constant 0 : index
    %c129 = arith.constant 129 : index
    %57 = vector.load %arg6[%c0_35, %c129] : memref<4x512xf32, #tpu.memory_space<vmem>>, vector<4x256xf32>
    %cst_36 = arith.constant 0.000000e+00 : f32
    %58 = vector.broadcast %cst_36 : f32 to vector<4x256xf32>
    %59 = arith.select %20, %57, %58 : vector<4x256xi1>, vector<4x256xf32>
    %c5 = arith.constant 5 : index
    %c0_37 = arith.constant 0 : index
    %c0_38 = arith.constant 0 : index
    %60 = vector.load %arg2[%c5, %c0_37, %c0_38] : memref<9x4x4xf32, #tpu.memory_space<vmem>>, vector<1x4x4xf32>
    %61 = vector.shape_cast %60 : vector<1x4x4xf32> to vector<4x4xf32>
    %cst_39 = arith.constant dense<0.000000e+00> : vector<4x256xf32>
    %62 = tpu.matmul %61, %59, %cst_39 {dimension_numbers = #tpu.dot_dimension_numbers<[1], [0], [0], [1], [0, 0, 1, 1], [], []>} : vector<4x4xf32>, vector<4x256xf32>, vector<4x256xf32> -> vector<4x256xf32>
    %63 = arith.addf %56, %62 : vector<4x256xf32>
    %c0_40 = arith.constant 0 : index
    %c143 = arith.constant 143 : index
    %64 = vector.load %arg6[%c0_40, %c143] : memref<4x512xf32, #tpu.memory_space<vmem>>, vector<4x256xf32>
    %cst_41 = arith.constant 0.000000e+00 : f32
    %65 = vector.broadcast %cst_41 : f32 to vector<4x256xf32>
    %66 = arith.select %18, %64, %65 : vector<4x256xi1>, vector<4x256xf32>
    %c6 = arith.constant 6 : index
    %c0_42 = arith.constant 0 : index
    %c0_43 = arith.constant 0 : index
    %67 = vector.load %arg2[%c6, %c0_42, %c0_43] : memref<9x4x4xf32, #tpu.memory_space<vmem>>, vector<1x4x4xf32>
    %68 = vector.shape_cast %67 : vector<1x4x4xf32> to vector<4x4xf32>
    %cst_44 = arith.constant dense<0.000000e+00> : vector<4x256xf32>
    %69 = tpu.matmul %68, %66, %cst_44 {dimension_numbers = #tpu.dot_dimension_numbers<[1], [0], [0], [1], [0, 0, 1, 1], [], []>} : vector<4x4xf32>, vector<4x256xf32>, vector<4x256xf32> -> vector<4x256xf32>
    %70 = arith.addf %63, %69 : vector<4x256xf32>
    %c0_45 = arith.constant 0 : index
    %c144 = arith.constant 144 : index
    %71 = vector.load %arg6[%c0_45, %c144] : memref<4x512xf32, #tpu.memory_space<vmem>>, vector<4x256xf32>
    %c7 = arith.constant 7 : index
    %c0_46 = arith.constant 0 : index
    %c0_47 = arith.constant 0 : index
    %72 = vector.load %arg2[%c7, %c0_46, %c0_47] : memref<9x4x4xf32, #tpu.memory_space<vmem>>, vector<1x4x4xf32>
    %73 = vector.shape_cast %72 : vector<1x4x4xf32> to vector<4x4xf32>
    %cst_48 = arith.constant dense<0.000000e+00> : vector<4x256xf32>
    %74 = tpu.matmul %73, %71, %cst_48 {dimension_numbers = #tpu.dot_dimension_numbers<[1], [0], [0], [1], [0, 0, 1, 1], [], []>} : vector<4x4xf32>, vector<4x256xf32>, vector<4x256xf32> -> vector<4x256xf32>
    %75 = arith.addf %70, %74 : vector<4x256xf32>
    %c0_49 = arith.constant 0 : index
    %c145 = arith.constant 145 : index
    %76 = vector.load %arg6[%c0_49, %c145] : memref<4x512xf32, #tpu.memory_space<vmem>>, vector<4x256xf32>
    %cst_50 = arith.constant 0.000000e+00 : f32
    %77 = vector.broadcast %cst_50 : f32 to vector<4x256xf32>
    %78 = arith.select %20, %76, %77 : vector<4x256xi1>, vector<4x256xf32>
    %c8 = arith.constant 8 : index
    %c0_51 = arith.constant 0 : index
    %c0_52 = arith.constant 0 : index
    %79 = vector.load %arg2[%c8, %c0_51, %c0_52] : memref<9x4x4xf32, #tpu.memory_space<vmem>>, vector<1x4x4xf32>
    %80 = vector.shape_cast %79 : vector<1x4x4xf32> to vector<4x4xf32>
    %cst_53 = arith.constant dense<0.000000e+00> : vector<4x256xf32>
    %81 = tpu.matmul %80, %78, %cst_53 {dimension_numbers = #tpu.dot_dimension_numbers<[1], [0], [0], [1], [0, 0, 1, 1], [], []>} : vector<4x4xf32>, vector<4x256xf32>, vector<4x256xf32> -> vector<4x256xf32>
    %82 = arith.addf %75, %81 : vector<4x256xf32>
    %c0_54 = arith.constant 0 : index
    %c0_55 = arith.constant 0 : index
    %c0_56 = arith.constant 0 : index
    %83 = vector.load %arg3[%c0_54, %c0_55, %c0_56] : memref<1x4x256xf32, #tpu.memory_space<vmem>>, vector<1x4x256xf32>
    %84 = vector.shape_cast %83 : vector<1x4x256xf32> to vector<4x256xf32>
    %85 = vector.shape_cast %82 : vector<4x256xf32> to vector<1x4x256xf32>
    tpu.vector_store %arg3[%c0_54, %c0_55, %c0_56], %85 {strides = array<i32>} : memref<1x4x256xf32, #tpu.memory_space<vmem>>, vector<1x4x256xf32>,
    %cst_57 = arith.constant dense<0.000000e+00> : vector<4xf32>
    %86 = vector.multi_reduction <add>, %82, %cst_57 [1] : vector<4x256xf32> to vector<4xf32>
    %87 = vector.shape_cast %86 : vector<4xf32> to vector<4x1xf32>
    %c0_58 = arith.constant 0 : index
    %c0_59 = arith.constant 0 : index
    %c0_60 = arith.constant 0 : index
    %88 = vector.load %arg4[%c0_58, %c0_59, %c0_60] : memref<1x4x1xf32, #tpu.memory_space<vmem>>, vector<1x4x1xf32>
    %89 = vector.shape_cast %88 : vector<1x4x1xf32> to vector<4x1xf32>
    %90 = vector.shape_cast %87 : vector<4x1xf32> to vector<1x4x1xf32>
    tpu.vector_store %arg4[%c0_58, %c0_59, %c0_60], %90 {strides = array<i32>} : memref<1x4x1xf32, #tpu.memory_space<vmem>>, vector<1x4x1xf32>,
    %91 = arith.mulf %82, %82 : vector<4x256xf32>
    %cst_61 = arith.constant dense<0.000000e+00> : vector<4xf32>
    %92 = vector.multi_reduction <add>, %91, %cst_61 [1] : vector<4x256xf32> to vector<4xf32>
    %93 = vector.shape_cast %92 : vector<4xf32> to vector<4x1xf32>
    %c0_62 = arith.constant 0 : index
    %c0_63 = arith.constant 0 : index
    %c0_64 = arith.constant 0 : index
    %94 = vector.load %arg5[%c0_62, %c0_63, %c0_64] : memref<1x4x1xf32, #tpu.memory_space<vmem>>, vector<1x4x1xf32>
    %95 = vector.shape_cast %94 : vector<1x4x1xf32> to vector<4x1xf32>
    %96 = vector.shape_cast %93 : vector<4x1xf32> to vector<1x4x1xf32>
    tpu.vector_store %arg5[%c0_62, %c0_63, %c0_64], %96 {strides = array<i32>} : memref<1x4x1xf32, #tpu.memory_space<vmem>>, vector<1x4x1xf32>,
    return
  }
  func.func @transform_0(%arg0: i32) -> (i32, i32, i32) {
    %c0_i32 = arith.constant 0 : i32
    %c0_i32_0 = arith.constant 0 : i32
    %c0_i32_1 = arith.constant 0 : i32
    return %arg0, %c0_i32, %c0_i32_0 : i32, i32, i32
  }
  func.func @transform_1(%arg0: i32) -> (i32, i32, i32) {
    %c0_i32 = arith.constant 0 : i32
    %c0_i32_0 = arith.constant 0 : i32
    %c0_i32_1 = arith.constant 0 : i32
    %c0_i32_2 = arith.constant 0 : i32
    return %c0_i32, %c0_i32_0, %c0_i32_1 : i32, i32, i32
  }
  func.func @transform_2(%arg0: i32) -> (i32, i32, i32) {
    %c0_i32 = arith.constant 0 : i32
    %c0_i32_0 = arith.constant 0 : i32
    %c0_i32_1 = arith.constant 0 : i32
    return %arg0, %c0_i32, %c0_i32_0 : i32, i32, i32
  }
  func.func @transform_3(%arg0: i32) -> (i32, i32, i32) {
    %c0_i32 = arith.constant 0 : i32
    %c0_i32_0 = arith.constant 0 : i32
    %c0_i32_1 = arith.constant 0 : i32
    return %arg0, %c0_i32, %c0_i32_0 : i32, i32, i32
  }
  func.func @transform_4(%arg0: i32) -> (i32, i32, i32) {
    %c0_i32 = arith.constant 0 : i32
    %c0_i32_0 = arith.constant 0 : i32
    %c0_i32_1 = arith.constant 0 : i32
    return %arg0, %c0_i32, %c0_i32_0 : i32, i32, i32
  }
}

module attributes {stable_mosaic.version = 11 : i64} {
  func.func @bn_relu_conv2_stats_kernel(%arg0: i32, %arg1: memref<1x4x256xf32, #tpu.memory_space<vmem>>, %arg2: memref<4x1xf32, #tpu.memory_space<vmem>>, %arg3: memref<4x1xf32, #tpu.memory_space<vmem>>, %arg4: memref<9x4x4xf32, #tpu.memory_space<vmem>>, %arg5: memref<1x4x256xf32, #tpu.memory_space<vmem>>, %arg6: memref<1x4x1xf32, #tpu.memory_space<vmem>>, %arg7: memref<1x4x1xf32, #tpu.memory_space<vmem>>, %arg8: memref<4x512xf32, #tpu.memory_space<vmem>>) attributes {dimension_semantics = [#tpu.dimension_semantics<parallel>], iteration_bounds = array<i64: 2>, scalar_prefetch = 0 : i64, scratch_operands = 1 : i64, tpu.core_type = #tpu.core_type<tc>, window_params = [{transform_indices = @transform_0, window_bounds = array<i64: 1, 4, 256>}, {pipeline_mode = #tpu.pipeline_mode<synchronous>, transform_indices = @transform_1, window_bounds = array<i64: 4, 1>}, {pipeline_mode = #tpu.pipeline_mode<synchronous>, transform_indices = @transform_2, window_bounds = array<i64: 4, 1>}, {pipeline_mode = #tpu.pipeline_mode<synchronous>, transform_indices = @transform_3, window_bounds = array<i64: 9, 4, 4>}, {transform_indices = @transform_4, window_bounds = array<i64: 1, 4, 256>}, {transform_indices = @transform_5, window_bounds = array<i64: 1, 4, 1>}, {transform_indices = @transform_6, window_bounds = array<i64: 1, 4, 1>}]} {
    %c0 = arith.constant 0 : index
    %c0_0 = arith.constant 0 : index
    %c0_1 = arith.constant 0 : index
    %0 = vector.load %arg1[%c0, %c0_0, %c0_1] : memref<1x4x256xf32, #tpu.memory_space<vmem>>, vector<1x4x256xf32>
    %1 = vector.shape_cast %0 : vector<1x4x256xf32> to vector<4x256xf32>
    %c0_2 = arith.constant 0 : index
    %c0_3 = arith.constant 0 : index
    %2 = vector.load %arg2[%c0_2, %c0_3] : memref<4x1xf32, #tpu.memory_space<vmem>>, vector<4x1xf32>
    %3 = vector.broadcast %2 : vector<4x1xf32> to vector<4x256xf32>
    %4 = arith.mulf %1, %3 : vector<4x256xf32>
    %c0_4 = arith.constant 0 : index
    %c0_5 = arith.constant 0 : index
    %5 = vector.load %arg3[%c0_4, %c0_5] : memref<4x1xf32, #tpu.memory_space<vmem>>, vector<4x1xf32>
    %6 = vector.broadcast %5 : vector<4x1xf32> to vector<4x256xf32>
    %7 = arith.addf %4, %6 : vector<4x256xf32>
    %cst = arith.constant 0.000000e+00 : f32
    %8 = vector.broadcast %cst : f32 to vector<4x256xf32>
    %9 = arith.maximumf %7, %8 : vector<4x256xf32>
    %10 = tpu.iota {dimensions = array<i32: 1>} : vector<4x256xi32>
    %c16_i32 = arith.constant 16 : i32
    %c0_i32 = arith.constant 0 : i32
    %11 = arith.cmpi eq, %c16_i32, %c0_i32 : i32
    %c1_i32 = arith.constant 1 : i32
    %12 = arith.select %11, %c1_i32, %c16_i32 : i32
    %13 = vector.broadcast %12 : i32 to vector<4x256xi32>
    %14 = arith.remsi %10, %13 : vector<4x256xi32>
    %c0_i32_6 = arith.constant 0 : i32
    %15 = vector.broadcast %c0_i32_6 : i32 to vector<4x256xi32>
    %16 = arith.cmpi ne, %14, %15 : vector<4x256xi32>
    %c0_i32_7 = arith.constant 0 : i32
    %17 = vector.broadcast %c0_i32_7 : i32 to vector<4x256xi32>
    %18 = arith.cmpi slt, %14, %17 : vector<4x256xi32>
    %c0_i32_8 = arith.constant 0 : i32
    %19 = arith.cmpi slt, %12, %c0_i32_8 : i32
    %20 = vector.broadcast %19 : i1 to vector<4x256xi1>
    %21 = vector.broadcast %20 : vector<4x256xi1> to vector<4x256xi1>
    %22 = arith.xori %18, %21 : vector<4x256xi1>
    %23 = arith.andi %22, %16 : vector<4x256xi1>
    %24 = vector.broadcast %12 : i32 to vector<4x256xi32>
    %25 = arith.addi %14, %24 : vector<4x256xi32>
    %26 = arith.select %23, %25, %14 : vector<4x256xi1>, vector<4x256xi32>
    %c1_i32_9 = arith.constant 1 : i32
    %27 = vector.broadcast %c1_i32_9 : i32 to vector<4x256xi32>
    %28 = arith.cmpi sge, %26, %27 : vector<4x256xi32>
    %c14_i32 = arith.constant 14 : i32
    %29 = vector.broadcast %c14_i32 : i32 to vector<4x256xi32>
    %30 = arith.cmpi sle, %26, %29 : vector<4x256xi32>
    %cst_10 = arith.constant 0.000000e+00 : f32
    %31 = vector.broadcast %cst_10 : f32 to vector<4x128xf32>
    %c0_11 = arith.constant 0 : index
    %c0_12 = arith.constant 0 : index
    %32 = vector.load %arg8[%c0_11, %c0_12] : memref<4x512xf32, #tpu.memory_space<vmem>>, vector<4x128xf32>
    tpu.vector_store %arg8[%c0_11, %c0_12], %31 {strides = array<i32>} : memref<4x512xf32, #tpu.memory_space<vmem>>, vector<4x128xf32>,
    %c0_13 = arith.constant 0 : index
    %c384 = arith.constant 384 : index
    %33 = vector.load %arg8[%c0_13, %c384] : memref<4x512xf32, #tpu.memory_space<vmem>>, vector<4x128xf32>
    tpu.vector_store %arg8[%c0_13, %c384], %31 {strides = array<i32>} : memref<4x512xf32, #tpu.memory_space<vmem>>, vector<4x128xf32>,
    %c0_14 = arith.constant 0 : index
    %c128 = arith.constant 128 : index
    %34 = vector.load %arg8[%c0_14, %c128] : memref<4x512xf32, #tpu.memory_space<vmem>>, vector<4x256xf32>
    tpu.vector_store %arg8[%c0_14, %c128], %9 {strides = array<i32>} : memref<4x512xf32, #tpu.memory_space<vmem>>, vector<4x256xf32>,
    %c0_15 = arith.constant 0 : index
    %c111 = arith.constant 111 : index
    %35 = vector.load %arg8[%c0_15, %c111] : memref<4x512xf32, #tpu.memory_space<vmem>>, vector<4x256xf32>
    %cst_16 = arith.constant 0.000000e+00 : f32
    %36 = vector.broadcast %cst_16 : f32 to vector<4x256xf32>
    %37 = arith.select %28, %35, %36 : vector<4x256xi1>, vector<4x256xf32>
    %c0_17 = arith.constant 0 : index
    %c0_18 = arith.constant 0 : index
    %c0_19 = arith.constant 0 : index
    %38 = vector.load %arg4[%c0_17, %c0_18, %c0_19] : memref<9x4x4xf32, #tpu.memory_space<vmem>>, vector<1x4x4xf32>
    %39 = vector.shape_cast %38 : vector<1x4x4xf32> to vector<4x4xf32>
    %cst_20 = arith.constant dense<0.000000e+00> : vector<4x256xf32>
    %40 = tpu.matmul %39, %37, %cst_20 {dimension_numbers = #tpu.dot_dimension_numbers<[1], [0], [0], [1], [0, 0, 1, 1], [], []>} : vector<4x4xf32>, vector<4x256xf32>, vector<4x256xf32> -> vector<4x256xf32>
    %c0_21 = arith.constant 0 : index
    %c112 = arith.constant 112 : index
    %41 = vector.load %arg8[%c0_21, %c112] : memref<4x512xf32, #tpu.memory_space<vmem>>, vector<4x256xf32>
    %c1 = arith.constant 1 : index
    %c0_22 = arith.constant 0 : index
    %c0_23 = arith.constant 0 : index
    %42 = vector.load %arg4[%c1, %c0_22, %c0_23] : memref<9x4x4xf32, #tpu.memory_space<vmem>>, vector<1x4x4xf32>
    %43 = vector.shape_cast %42 : vector<1x4x4xf32> to vector<4x4xf32>
    %cst_24 = arith.constant dense<0.000000e+00> : vector<4x256xf32>
    %44 = tpu.matmul %43, %41, %cst_24 {dimension_numbers = #tpu.dot_dimension_numbers<[1], [0], [0], [1], [0, 0, 1, 1], [], []>} : vector<4x4xf32>, vector<4x256xf32>, vector<4x256xf32> -> vector<4x256xf32>
    %45 = arith.addf %40, %44 : vector<4x256xf32>
    %c0_25 = arith.constant 0 : index
    %c113 = arith.constant 113 : index
    %46 = vector.load %arg8[%c0_25, %c113] : memref<4x512xf32, #tpu.memory_space<vmem>>, vector<4x256xf32>
    %cst_26 = arith.constant 0.000000e+00 : f32
    %47 = vector.broadcast %cst_26 : f32 to vector<4x256xf32>
    %48 = arith.select %30, %46, %47 : vector<4x256xi1>, vector<4x256xf32>
    %c2 = arith.constant 2 : index
    %c0_27 = arith.constant 0 : index
    %c0_28 = arith.constant 0 : index
    %49 = vector.load %arg4[%c2, %c0_27, %c0_28] : memref<9x4x4xf32, #tpu.memory_space<vmem>>, vector<1x4x4xf32>
    %50 = vector.shape_cast %49 : vector<1x4x4xf32> to vector<4x4xf32>
    %cst_29 = arith.constant dense<0.000000e+00> : vector<4x256xf32>
    %51 = tpu.matmul %50, %48, %cst_29 {dimension_numbers = #tpu.dot_dimension_numbers<[1], [0], [0], [1], [0, 0, 1, 1], [], []>} : vector<4x4xf32>, vector<4x256xf32>, vector<4x256xf32> -> vector<4x256xf32>
    %52 = arith.addf %45, %51 : vector<4x256xf32>
    %c0_30 = arith.constant 0 : index
    %c127 = arith.constant 127 : index
    %53 = vector.load %arg8[%c0_30, %c127] : memref<4x512xf32, #tpu.memory_space<vmem>>, vector<4x256xf32>
    %cst_31 = arith.constant 0.000000e+00 : f32
    %54 = vector.broadcast %cst_31 : f32 to vector<4x256xf32>
    %55 = arith.select %28, %53, %54 : vector<4x256xi1>, vector<4x256xf32>
    %c3 = arith.constant 3 : index
    %c0_32 = arith.constant 0 : index
    %c0_33 = arith.constant 0 : index
    %56 = vector.load %arg4[%c3, %c0_32, %c0_33] : memref<9x4x4xf32, #tpu.memory_space<vmem>>, vector<1x4x4xf32>
    %57 = vector.shape_cast %56 : vector<1x4x4xf32> to vector<4x4xf32>
    %cst_34 = arith.constant dense<0.000000e+00> : vector<4x256xf32>
    %58 = tpu.matmul %57, %55, %cst_34 {dimension_numbers = #tpu.dot_dimension_numbers<[1], [0], [0], [1], [0, 0, 1, 1], [], []>} : vector<4x4xf32>, vector<4x256xf32>, vector<4x256xf32> -> vector<4x256xf32>
    %59 = arith.addf %52, %58 : vector<4x256xf32>
    %c0_35 = arith.constant 0 : index
    %c128_36 = arith.constant 128 : index
    %60 = vector.load %arg8[%c0_35, %c128_36] : memref<4x512xf32, #tpu.memory_space<vmem>>, vector<4x256xf32>
    %c4 = arith.constant 4 : index
    %c0_37 = arith.constant 0 : index
    %c0_38 = arith.constant 0 : index
    %61 = vector.load %arg4[%c4, %c0_37, %c0_38] : memref<9x4x4xf32, #tpu.memory_space<vmem>>, vector<1x4x4xf32>
    %62 = vector.shape_cast %61 : vector<1x4x4xf32> to vector<4x4xf32>
    %cst_39 = arith.constant dense<0.000000e+00> : vector<4x256xf32>
    %63 = tpu.matmul %62, %60, %cst_39 {dimension_numbers = #tpu.dot_dimension_numbers<[1], [0], [0], [1], [0, 0, 1, 1], [], []>} : vector<4x4xf32>, vector<4x256xf32>, vector<4x256xf32> -> vector<4x256xf32>
    %64 = arith.addf %59, %63 : vector<4x256xf32>
    %c0_40 = arith.constant 0 : index
    %c129 = arith.constant 129 : index
    %65 = vector.load %arg8[%c0_40, %c129] : memref<4x512xf32, #tpu.memory_space<vmem>>, vector<4x256xf32>
    %cst_41 = arith.constant 0.000000e+00 : f32
    %66 = vector.broadcast %cst_41 : f32 to vector<4x256xf32>
    %67 = arith.select %30, %65, %66 : vector<4x256xi1>, vector<4x256xf32>
    %c5 = arith.constant 5 : index
    %c0_42 = arith.constant 0 : index
    %c0_43 = arith.constant 0 : index
    %68 = vector.load %arg4[%c5, %c0_42, %c0_43] : memref<9x4x4xf32, #tpu.memory_space<vmem>>, vector<1x4x4xf32>
    %69 = vector.shape_cast %68 : vector<1x4x4xf32> to vector<4x4xf32>
    %cst_44 = arith.constant dense<0.000000e+00> : vector<4x256xf32>
    %70 = tpu.matmul %69, %67, %cst_44 {dimension_numbers = #tpu.dot_dimension_numbers<[1], [0], [0], [1], [0, 0, 1, 1], [], []>} : vector<4x4xf32>, vector<4x256xf32>, vector<4x256xf32> -> vector<4x256xf32>
    %71 = arith.addf %64, %70 : vector<4x256xf32>
    %c0_45 = arith.constant 0 : index
    %c143 = arith.constant 143 : index
    %72 = vector.load %arg8[%c0_45, %c143] : memref<4x512xf32, #tpu.memory_space<vmem>>, vector<4x256xf32>
    %cst_46 = arith.constant 0.000000e+00 : f32
    %73 = vector.broadcast %cst_46 : f32 to vector<4x256xf32>
    %74 = arith.select %28, %72, %73 : vector<4x256xi1>, vector<4x256xf32>
    %c6 = arith.constant 6 : index
    %c0_47 = arith.constant 0 : index
    %c0_48 = arith.constant 0 : index
    %75 = vector.load %arg4[%c6, %c0_47, %c0_48] : memref<9x4x4xf32, #tpu.memory_space<vmem>>, vector<1x4x4xf32>
    %76 = vector.shape_cast %75 : vector<1x4x4xf32> to vector<4x4xf32>
    %cst_49 = arith.constant dense<0.000000e+00> : vector<4x256xf32>
    %77 = tpu.matmul %76, %74, %cst_49 {dimension_numbers = #tpu.dot_dimension_numbers<[1], [0], [0], [1], [0, 0, 1, 1], [], []>} : vector<4x4xf32>, vector<4x256xf32>, vector<4x256xf32> -> vector<4x256xf32>
    %78 = arith.addf %71, %77 : vector<4x256xf32>
    %c0_50 = arith.constant 0 : index
    %c144 = arith.constant 144 : index
    %79 = vector.load %arg8[%c0_50, %c144] : memref<4x512xf32, #tpu.memory_space<vmem>>, vector<4x256xf32>
    %c7 = arith.constant 7 : index
    %c0_51 = arith.constant 0 : index
    %c0_52 = arith.constant 0 : index
    %80 = vector.load %arg4[%c7, %c0_51, %c0_52] : memref<9x4x4xf32, #tpu.memory_space<vmem>>, vector<1x4x4xf32>
    %81 = vector.shape_cast %80 : vector<1x4x4xf32> to vector<4x4xf32>
    %cst_53 = arith.constant dense<0.000000e+00> : vector<4x256xf32>
    %82 = tpu.matmul %81, %79, %cst_53 {dimension_numbers = #tpu.dot_dimension_numbers<[1], [0], [0], [1], [0, 0, 1, 1], [], []>} : vector<4x4xf32>, vector<4x256xf32>, vector<4x256xf32> -> vector<4x256xf32>
    %83 = arith.addf %78, %82 : vector<4x256xf32>
    %c0_54 = arith.constant 0 : index
    %c145 = arith.constant 145 : index
    %84 = vector.load %arg8[%c0_54, %c145] : memref<4x512xf32, #tpu.memory_space<vmem>>, vector<4x256xf32>
    %cst_55 = arith.constant 0.000000e+00 : f32
    %85 = vector.broadcast %cst_55 : f32 to vector<4x256xf32>
    %86 = arith.select %30, %84, %85 : vector<4x256xi1>, vector<4x256xf32>
    %c8 = arith.constant 8 : index
    %c0_56 = arith.constant 0 : index
    %c0_57 = arith.constant 0 : index
    %87 = vector.load %arg4[%c8, %c0_56, %c0_57] : memref<9x4x4xf32, #tpu.memory_space<vmem>>, vector<1x4x4xf32>
    %88 = vector.shape_cast %87 : vector<1x4x4xf32> to vector<4x4xf32>
    %cst_58 = arith.constant dense<0.000000e+00> : vector<4x256xf32>
    %89 = tpu.matmul %88, %86, %cst_58 {dimension_numbers = #tpu.dot_dimension_numbers<[1], [0], [0], [1], [0, 0, 1, 1], [], []>} : vector<4x4xf32>, vector<4x256xf32>, vector<4x256xf32> -> vector<4x256xf32>
    %90 = arith.addf %83, %89 : vector<4x256xf32>
    %c0_59 = arith.constant 0 : index
    %c0_60 = arith.constant 0 : index
    %c0_61 = arith.constant 0 : index
    %91 = vector.load %arg5[%c0_59, %c0_60, %c0_61] : memref<1x4x256xf32, #tpu.memory_space<vmem>>, vector<1x4x256xf32>
    %92 = vector.shape_cast %91 : vector<1x4x256xf32> to vector<4x256xf32>
    %93 = vector.shape_cast %90 : vector<4x256xf32> to vector<1x4x256xf32>
    tpu.vector_store %arg5[%c0_59, %c0_60, %c0_61], %93 {strides = array<i32>} : memref<1x4x256xf32, #tpu.memory_space<vmem>>, vector<1x4x256xf32>,
    %cst_62 = arith.constant dense<0.000000e+00> : vector<4xf32>
    %94 = vector.multi_reduction <add>, %90, %cst_62 [1] : vector<4x256xf32> to vector<4xf32>
    %95 = vector.shape_cast %94 : vector<4xf32> to vector<4x1xf32>
    %c0_63 = arith.constant 0 : index
    %c0_64 = arith.constant 0 : index
    %c0_65 = arith.constant 0 : index
    %96 = vector.load %arg6[%c0_63, %c0_64, %c0_65] : memref<1x4x1xf32, #tpu.memory_space<vmem>>, vector<1x4x1xf32>
    %97 = vector.shape_cast %96 : vector<1x4x1xf32> to vector<4x1xf32>
    %98 = vector.shape_cast %95 : vector<4x1xf32> to vector<1x4x1xf32>
    tpu.vector_store %arg6[%c0_63, %c0_64, %c0_65], %98 {strides = array<i32>} : memref<1x4x1xf32, #tpu.memory_space<vmem>>, vector<1x4x1xf32>,
    %99 = arith.mulf %90, %90 : vector<4x256xf32>
    %cst_66 = arith.constant dense<0.000000e+00> : vector<4xf32>
    %100 = vector.multi_reduction <add>, %99, %cst_66 [1] : vector<4x256xf32> to vector<4xf32>
    %101 = vector.shape_cast %100 : vector<4xf32> to vector<4x1xf32>
    %c0_67 = arith.constant 0 : index
    %c0_68 = arith.constant 0 : index
    %c0_69 = arith.constant 0 : index
    %102 = vector.load %arg7[%c0_67, %c0_68, %c0_69] : memref<1x4x1xf32, #tpu.memory_space<vmem>>, vector<1x4x1xf32>
    %103 = vector.shape_cast %102 : vector<1x4x1xf32> to vector<4x1xf32>
    %104 = vector.shape_cast %101 : vector<4x1xf32> to vector<1x4x1xf32>
    tpu.vector_store %arg7[%c0_67, %c0_68, %c0_69], %104 {strides = array<i32>} : memref<1x4x1xf32, #tpu.memory_space<vmem>>, vector<1x4x1xf32>,
    return
  }
  func.func @transform_0(%arg0: i32) -> (i32, i32, i32) {
    %c0_i32 = arith.constant 0 : i32
    %c0_i32_0 = arith.constant 0 : i32
    %c0_i32_1 = arith.constant 0 : i32
    return %arg0, %c0_i32, %c0_i32_0 : i32, i32, i32
  }
  func.func @transform_1(%arg0: i32) -> (i32, i32) {
    %c0_i32 = arith.constant 0 : i32
    %c0_i32_0 = arith.constant 0 : i32
    %c0_i32_1 = arith.constant 0 : i32
    return %c0_i32, %c0_i32_0 : i32, i32
  }
  func.func @transform_2(%arg0: i32) -> (i32, i32) {
    %c0_i32 = arith.constant 0 : i32
    %c0_i32_0 = arith.constant 0 : i32
    %c0_i32_1 = arith.constant 0 : i32
    return %c0_i32, %c0_i32_0 : i32, i32
  }
  func.func @transform_3(%arg0: i32) -> (i32, i32, i32) {
    %c0_i32 = arith.constant 0 : i32
    %c0_i32_0 = arith.constant 0 : i32
    %c0_i32_1 = arith.constant 0 : i32
    %c0_i32_2 = arith.constant 0 : i32
    return %c0_i32, %c0_i32_0, %c0_i32_1 : i32, i32, i32
  }
  func.func @transform_4(%arg0: i32) -> (i32, i32, i32) {
    %c0_i32 = arith.constant 0 : i32
    %c0_i32_0 = arith.constant 0 : i32
    %c0_i32_1 = arith.constant 0 : i32
    return %arg0, %c0_i32, %c0_i32_0 : i32, i32, i32
  }
  func.func @transform_5(%arg0: i32) -> (i32, i32, i32) {
    %c0_i32 = arith.constant 0 : i32
    %c0_i32_0 = arith.constant 0 : i32
    %c0_i32_1 = arith.constant 0 : i32
    return %arg0, %c0_i32, %c0_i32_0 : i32, i32, i32
  }
  func.func @transform_6(%arg0: i32) -> (i32, i32, i32) {
    %c0_i32 = arith.constant 0 : i32
    %c0_i32_0 = arith.constant 0 : i32
    %c0_i32_1 = arith.constant 0 : i32
    return %arg0, %c0_i32, %c0_i32_0 : i32, i32, i32
  }
}

</mosaic_0001>

<bundles_post_ra>
// kernel: residual_block_forward.2
= control target key start
LH: loop header
LB: loop body
LE: loop exit
PB: predicated region body
PF: predicated region fallthrough
CT: control target
= control target key end

     0   :  { %s1383_s15 = smov 0   ;;  %s1542_s0 = inlined_call_operand.vmem [shape: f32[2,4,256], index: 0, kind: input, shape index: {}]   ;;  %s1543_s1 = inlined_call_operand.vmem [shape: f32[9,4,4], index: 1, kind: input, shape index: {}]   ;;  %s1544_s2 = inlined_call_operand.vmem [shape: f32[2,4,256], index: 2, kind: output, shape index: {0}]   ;;  %s1545_s3 = inlined_call_operand.vmem [shape: f32[2,4,1], index: 3, kind: output, shape index: {1}]   ;;  %s1546_s4 = inlined_call_operand.vmem [shape: f32[2,4,1], index: 4, kind: output, shape index: {2}]  }
   0x1 LB: > { %s1272_s16 = sadd.s32 4294967295, %s1347_s15   ;;  %p1276_p0 = scmp.ge.s32.totalorder %s1347_s15, 1  ;;  %s1347_s15 = sphi %s1383_s15, %s15_s15  }
   0x2   : > { %p167_p1 = scmp.lt.s32.totalorder %s1347_s15, 3 }
   0x4   : > { %p168_p2 = pnand %p1276_p0, %p167_p1 }
   0x5   : > { %p201_p3 = scmp.lt.s32.totalorder (!%p168_p2), %s1272_s16, 1  ;;  %s1350_s21 = smov (!%p168_p2), 17  }
   0x6   : > { %171 = sbr.rel (%p168_p2) target bundleno = 527 (0x20f), region = 28  ;;  %s1351_s22 = smov (!%p168_p2), 16  }
   0x7   : > { %s1352_s23 = smov (!%p168_p2), 15   ;;  %s1353_s24 = smov (!%p168_p2), 1  }
   0x8   : > { %s1354_s25 = smov (!%p168_p2), 127   ;;  %s1355_s26 = smov (!%p168_p2), 113  }
   0x9   : > { %s1356_s27 = smov (!%p168_p2), 112   ;;  %s1357_s28 = smov (!%p168_p2), 111  }
   0xb   : > { %v1349_v0 = vmov 0.0   ;;  %s1556_s16 = smov (!%p201_p3, %s1272_s16), 1  ;;  %v219_v12 = vlaneseq  ;;  %vm265_vm0 = vcmask 138240   ;;  %vm281_vm1 = vcmask 130048   ;;  %v1283_v31 = vld [vmem:[%s1543_s1 + $0x4] sm:$0xf] }
   0xc   : > { %251 = vst [vmem:[#allocation2] sm:$0xf] %v1349_v0  ;;  %252 = vst [vmem:[#allocation2 + $0xc] sm:$0xf] %v1349_v0  ;;  %357 = vmatprep.mubr.f32.mxu0 %v1349_v0  ;;  %437 = vmatprep.mubr.f32.mxu1 %v1349_v0  ;;  %s1320_s17 = sshll.u32 %s1556_s16, 3  ;;  %vm288_vm2 = vcmask 1043456  }
   0xd   : > { %s205_s20 = scalar_lea.vmem %s1542_s0, %s1320_s17  ;;  %v220_v13 = vand.u32 127, %v219_v12  ;;  %vm284_vm5 = vcmask 31744   ;;  %vm455_vm6 = vcmask 121856   ;;  %v272_v34 = vld [vmem:[%s1543_s1] sm:$0xf]  ;;  %vm557_vm9 = vcmask 7168  }
   0xe   : > { %v1403_v1 = vld [vmem:[%s205_s20] sm:$0xff]  ;;  %v1290_v43 = vld [vmem:[%s1543_s1 + $0x8] sm:$0xf]  ;;  %vm744_vm10 = vcmask 1039360   ;;  %v1294_v50 = vld [vmem:[%s1543_s1 + $0xc] sm:$0xf] }
   0xf   : > { %253 = vst [vmem:[#allocation2 + $0x4] sm:$0xff] %v1403_v1  ;;  %v1408_v7 = vcombine.high %v1403_v1, %v1403_v1  ;;  %v221_v16 = vadd.s32 128, %v220_v13  ;;  %v226_v20 = vand.u32 15, %v220_v13  ;;  %v1298_v51 = vld [vmem:[%s1543_s1 + $0x10] sm:$0xf]  ;;  %vm846_vm11 = vcmask 924672  }
  0x10   : > { %v1302_v59 = vld [vmem:[%s1543_s1 + $0x14] sm:$0xf]  ;;  %vm950_vm12 = vcmask 916480   ;;  %vm1044_vm13 = vcmask 908288   ;;  %vm1145_vm14 = vcmask 3072  }
  0x11   : > { %v233_v19 = vand.u32 15, %v221_v16  ;;  %vm1422_vm4 = vcmp.ge.s32.totalorder %v226_v20, 1  ;;  %vm1439_vm7 = vcmp.le.s32.totalorder %v226_v20, 14 }
  0x13   : > { %v734_v8 = vld [vmem:[#allocation2 + $0xc] sm:$0xf]  ;;  %vm1418_vm3 = vcmp.ge.s32.totalorder %v233_v19, 1  ;;  %vm1443_vm8 = vcmp.le.s32.totalorder %v233_v19, 14 }
  0x14   : > { %v836_v9 = vld [vmem:[#allocation2 + $0xc] sm:$0xf] }
  0x15   : > { %v938_v10 = vld [vmem:[#allocation2 + $0xc] sm:$0xf] }
  0x16   : > { %v255_v2 = vld [vmem:[#allocation2 + $0x8] sm:$0xf]  ;;  %v254_v3 = vld [vmem:[#allocation2] sm:$0xff]  ;;  %v1034_v11 = vld [vmem:[#allocation2 + $0xc] sm:$0xf] }
  0x17   : > { %263 = vrot.lane.b32.xlu1 %v255_v2, %s1350_s21  ;;  %279 = vrot.lane.b32.xlu0 %v255_v2, %s1351_s22  ;;  %v445_v4 = vld [vmem:[#allocation2 + $0x8] sm:$0xf]  ;;  %v448_v5 = vcombine.high %v254_v3, %v254_v3 }
  0x18   : > { %v547_v6 = vld [vmem:[#allocation2 + $0x8] sm:$0xf] }
  0x1b   : > { %259 = vrot.lane.b32.xlu1 %v254_v3, %s1350_s21  ;;  %275 = vrot.lane.b32.xlu0 %v254_v3, %s1351_s22 }
  0x1f   : > { %453 = vrot.lane.b32.xlu1 %v445_v4, %s1352_s23  ;;  %449 = vrot.lane.b32.xlu0 %v254_v3, %s1352_s23  ;;  %v1306_v4 = vld [vmem:[%s1543_s1 + $0x18] sm:$0xf] }
  0x23   : > { %261 = vrot.lane.b32.xlu1 %v448_v5, %s1350_s21  ;;  %277 = vrot.lane.b32.xlu0 %v448_v5, %s1351_s22 }
  0x27   : > { %553 = vrot.lane.b32.xlu1 %v448_v5, %s1353_s24  ;;  %451 = vrot.lane.b32.xlu0 %v448_v5, %s1352_s23 }
  0x2b   : > { %551 = vrot.lane.b32.xlu1 %v254_v3, %s1353_s24  ;;  %555 = vrot.lane.b32.xlu0 %v547_v6, %s1353_s24 }
  0x2f   : > { %742 = vrot.lane.b32.xlu1 %v734_v8, %s1354_s25  ;;  %740 = vrot.lane.b32.xlu0 %v1408_v7, %s1354_s25 }
  0x33   : > { %842 = vrot.lane.b32.xlu1 %v1408_v7, %s1355_s26  ;;  %738 = vrot.lane.b32.xlu0 %v1403_v1, %s1354_s25 }
  0x37   : > { %840 = vrot.lane.b32.xlu1 %v1403_v1, %s1355_s26  ;;  %844 = vrot.lane.b32.xlu0 %v836_v9, %s1355_s26  ;;  %s210_s26 = scalar_lea.vmem %s1544_s2, %s1320_s17 }
  0x3b   : > { %948 = vrot.lane.b32.xlu1 %v938_v10, %s1356_s27  ;;  %946 = vrot.lane.b32.xlu0 %v1408_v7, %s1356_s27  ;;  %v1310_v10 = vld [vmem:[%s1543_s1 + $0x1c] sm:$0xf] }
  0x3f   : > { %1040 = vrot.lane.b32.xlu1 %v1408_v7, %s1357_s28  ;;  %944 = vrot.lane.b32.xlu0 %v1403_v1, %s1356_s27  ;;  %s1281_s27 = sshll.u32 %s1556_s16, 2 }
  0x40   : > { %s214_s17 = scalar_lea.vmem %s1545_s3, %s1281_s27  ;;  %s218_s6 = scalar_lea.vmem %s1546_s4, %s1281_s27 }
  0x43   : > { %1038 = vrot.lane.b32.xlu1 %v1403_v1, %s1357_s28  ;;  %1042 = vrot.lane.b32.xlu0 %v1034_v11, %s1357_s28 }
  0x89   : > { %v264_v14 = vpop.permute.xlu1 %263  ;;  %v280_v15 = vpop.permute.xlu0 %279 }
  0x8d   : > { %v260_v17 = vpop.permute.xlu1 %259  ;;  %v276_v18 = vpop.permute.xlu0 %275 }
  0x91   : > { %v454_v21 = vpop.permute.xlu1 %453  ;;  %v450_v22 = vpop.permute.xlu0 %449 }
  0x95   : > { %v262_v25 = vpop.permute.xlu1 %261  ;;  %v278_v26 = vpop.permute.xlu0 %277 }
  0x96   : > { %v266_v27 = vsel %vm265_vm0, %v260_v17, %v262_v25  ;;  %v283_v28 = vsel %vm281_vm1, %v278_v26, %v280_v15  ;;  %v282_v29 = vsel %vm281_vm1, %v276_v18, %v278_v26  ;;  %v267_v30 = vsel %vm265_vm0, %v262_v25, %v264_v14  ;;  %v1314_v17 = vld [vmem:[%s1543_s1 + $0x20] sm:$0xf] }
  0x97   : > { %1284 = vmatprep.subr.msk.mxu0 %vm288_vm2, %v283_v28  ;;  %v271_v32 = vsel %vm1418_vm3, %v267_v30, 0.0  ;;  %v270_v33 = vsel %vm1422_vm4, %v266_v27, 0.0 }
  0x98   : > { %1285 = vmatpush1.msk.msra.mxu0 %vm288_vm2, %v282_v29  ;;  %1287 = vmatprep.subr.msk.mxu1 %vm288_vm2, %v271_v32 }
  0x99   : > { %1288 = vmatpush1.msk.msra.mxu1 %vm288_vm2, %v270_v33  ;;  %v554_v37 = vpop.permute.xlu1 %553  ;;  %v452_v38 = vpop.permute.xlu0 %451  ;;  %1286 = vmatmul.mubr.msk.f32.vlgmr.msra.gmra.mxu0 %vm284_vm5, %v1283_v31 }
  0x9a   : > { %v456_v39 = vsel %vm455_vm6, %v450_v22, %v452_v38  ;;  %v457_v40 = vsel %vm455_vm6, %v452_v38, %v454_v21  ;;  %1289 = vmatmul.mubr.msk.f32.vlgmr.msra.gmra.mxu1 %vm284_vm5, %v272_v34  ;;  %537 = vmatprep.mubr.f32.mxu0 %v1349_v0 }
  0x9b   : > { %v460_v41 = vsel %vm1439_vm7, %v456_v39, 0.0  ;;  %v461_v42 = vsel %vm1443_vm8, %v457_v40, 0.0  ;;  %639 = vmatprep.mubr.f32.mxu1 %v1349_v0 }
  0x9c   : > { %1291 = vmatprep.subr.msk.mxu0 %vm288_vm2, %v461_v42 }
  0x9d   : > { %v552_v44 = vpop.permute.xlu1 %551  ;;  %1292 = vmatpush1.msk.msra.mxu0 %vm288_vm2, %v460_v41  ;;  %v556_v45 = vpop.permute.xlu0 %555 }
  0x9e   : > { %v558_v46 = vsel %vm557_vm9, %v552_v44, %v554_v37  ;;  %v559_v47 = vsel %vm557_vm9, %v554_v37, %v556_v45  ;;  %1293 = vmatmul.mubr.msk.f32.vlgmr.msra.gmra.mxu0 %vm284_vm5, %v1290_v43  ;;  %1299 = vmatprep.subr.msk.mxu0 %vm288_vm2, %v1408_v7 }
  0x9f   : > { %v562_v48 = vsel %vm1422_vm4, %v558_v46, 0.0  ;;  %v563_v49 = vsel %vm1418_vm3, %v559_v47, 0.0  ;;  %1300 = vmatpush1.msk.msra.mxu0 %vm288_vm2, %v1403_v1  ;;  %724 = vmatprep.mubr.f32.mxu0 %v1349_v0 }
  0xa0   : > { %1295 = vmatprep.subr.msk.mxu1 %vm288_vm2, %v563_v49 }
  0xa1   : > { %v743_v52 = vpop.permute.xlu1 %742  ;;  %1296 = vmatpush1.msk.msra.mxu1 %vm288_vm2, %v562_v48  ;;  %v741_v53 = vpop.permute.xlu0 %740 }
  0xa2   : > { %v746_v54 = vsel %vm744_vm10, %v741_v53, %v743_v52  ;;  %1297 = vmatmul.mubr.msk.f32.vlgmr.msra.gmra.mxu1 %vm284_vm5, %v1294_v50  ;;  %1301 = vmatmul.mubr.msk.f32.vlgmr.msra.gmra.mxu0 %vm284_vm5, %v1298_v51 }
  0xa3   : > { %v750_v55 = vsel %vm1443_vm8, %v746_v54, 0.0  ;;  %826 = vmatprep.mubr.f32.mxu1 %v1349_v0  ;;  %928 = vmatprep.mubr.f32.mxu0 %v1349_v0 }
  0xa4   : > { %1303 = vmatprep.subr.msk.mxu1 %vm288_vm2, %v750_v55 }
  0xa5   : > { %v843_v56 = vpop.permute.xlu1 %842  ;;  %v739_v57 = vpop.permute.xlu0 %738 }
  0xa6   : > { %v745_v58 = vsel %vm744_vm10, %v739_v57, %v741_v53 }
  0xa7   : > { %v749_v60 = vsel %vm1439_vm7, %v745_v58, 0.0 }
  0xa8   : > { %1304 = vmatpush1.msk.msra.mxu1 %vm288_vm2, %v749_v60 }
  0xa9   : > { %v841_v61 = vpop.permute.xlu1 %840  ;;  %v845_v62 = vpop.permute.xlu0 %844  ;;  %1305 = vmatmul.mubr.msk.f32.vlgmr.msra.gmra.mxu1 %vm284_vm5, %v1302_v59 }
  0xaa   : > { %v847_v63 = vsel %vm846_vm11, %v841_v61, %v843_v56  ;;  %v848_v1 = vsel %vm846_vm11, %v843_v56, %v845_v62  ;;  %1024 = vmatprep.mubr.f32.mxu1 %v1349_v0 }
  0xab   : > { %v851_v2 = vsel %vm1422_vm4, %v847_v63, 0.0  ;;  %v852_v3 = vsel %vm1418_vm3, %v848_v1, 0.0 }
  0xac   : > { %1307 = vmatprep.subr.msk.mxu0 %vm288_vm2, %v852_v3 }
  0xad   : > { %v949_v5 = vpop.permute.xlu1 %948  ;;  %1308 = vmatpush1.msk.msra.mxu0 %vm288_vm2, %v851_v2  ;;  %v947_v6 = vpop.permute.xlu0 %946 }
  0xae   : > { %v952_v7 = vsel %vm950_vm12, %v947_v6, %v949_v5  ;;  %1309 = vmatmul.mubr.msk.f32.vlgmr.msra.gmra.mxu0 %vm284_vm5, %v1306_v4 }
  0xaf   : > { %1311 = vmatprep.subr.msk.mxu1 %vm288_vm2, %v952_v7  ;;  %1126 = vmatprep.mubr.f32.mxu0 %v1349_v0 }
  0xb1   : > { %v1041_v8 = vpop.permute.xlu1 %1040  ;;  %v945_v9 = vpop.permute.xlu0 %944 }
  0xb2   : > { %v951_v11 = vsel %vm950_vm12, %v945_v9, %v947_v6 }
  0xb3   : > { %1312 = vmatpush1.msk.msra.mxu1 %vm288_vm2, %v951_v11 }
  0xb4   : > { %1313 = vmatmul.mubr.msk.f32.vlgmr.msra.gmra.mxu1 %vm284_vm5, %v1310_v10 }
  0xb5   : > { %v1039_v12 = vpop.permute.xlu1 %1038  ;;  %v1043_v13 = vpop.permute.xlu0 %1042 }
  0xb6   : > { %v1045_v14 = vsel %vm1044_vm13, %v1039_v12, %v1041_v8  ;;  %v1046_v15 = vsel %vm1044_vm13, %v1041_v8, %v1043_v13 }
  0xb7   : > { %v1049_v16 = vsel %vm1439_vm7, %v1045_v14, 0.0  ;;  %v1050_v0 = vsel %vm1443_vm8, %v1046_v15, 0.0 }
  0xb8   : > { %1315 = vmatprep.subr.msk.mxu0 %vm288_vm2, %v1050_v0 }
  0xb9   : > { %1316 = vmatpush1.msk.msra.mxu0 %vm288_vm2, %v1049_v16 }
  0xba   : > { %1317 = vmatmul.mubr.msk.f32.vlgmr.msra.gmra.mxu0 %vm284_vm5, %v1314_v17 }
 0x159   : > { %v359_v18 = vpop.f32.mrf.mxu0 }
 0x15a   : > { %v439_v20 = vpop.f32.mrf.mxu1 }
 0x15b   : > { %v361_v19 = vpop.f32.mrf.mxu0  ;;  %v440_v23 = vadd.f32 %v439_v20, %v359_v18 }
 0x15c   : > { %v441_v21 = vpop.f32.mrf.mxu1 }
 0x15d   : > { %v442_v24 = vadd.f32 %v441_v21, %v361_v19 }
 0x15e   : > { %v539_v22 = vpop.f32.mrf.mxu0 }
 0x15f   : > { %v544_v27 = vadd.f32 %v539_v22, %v440_v23 }
 0x160   : > { %v541_v25 = vpop.f32.mrf.mxu0 }
 0x161   : > { %v545_v28 = vadd.f32 %v541_v25, %v442_v24 }
 0x162   : > { %v641_v26 = vpop.f32.mrf.mxu1  ;;  %v726_v30 = vpop.f32.mrf.mxu0 }
 0x163   : > { %v646_v31 = vadd.f32 %v641_v26, %v544_v27 }
 0x164   : > { %v643_v29 = vpop.f32.mrf.mxu1  ;;  %v728_v33 = vpop.f32.mrf.mxu0 }
 0x165   : > { %v647_v32 = vadd.f32 %v643_v29, %v545_v28  ;;  %v731_v35 = vadd.f32 %v726_v30, %v646_v31 }
 0x167   : > { %v732_v36 = vadd.f32 %v728_v33, %v647_v32 }
 0x169   : > { %v828_v34 = vpop.f32.mrf.mxu1 }
 0x16a   : > { %v833_v39 = vadd.f32 %v828_v34, %v731_v35 }
 0x16b   : > { %v830_v37 = vpop.f32.mrf.mxu1 }
 0x16c   : > { %v834_v40 = vadd.f32 %v830_v37, %v732_v36 }
 0x16e   : > { %v930_v38 = vpop.f32.mrf.mxu0 }
 0x16f   : > { %v935_v43 = vadd.f32 %v930_v38, %v833_v39 }
 0x170   : > { %v932_v41 = vpop.f32.mrf.mxu0 }
 0x171   : > { %v936_v44 = vadd.f32 %v932_v41, %v834_v40 }
 0x174   : > { %v1026_v42 = vpop.f32.mrf.mxu1 }
 0x175   : > { %v1031_v46 = vadd.f32 %v1026_v42, %v935_v43 }
 0x176   : > { %v1028_v45 = vpop.f32.mrf.mxu1 }
 0x177   : > { %v1032_v48 = vadd.f32 %v1028_v45, %v936_v44 }
 0x17a   : > { %v1128_v47 = vpop.f32.mrf.mxu0 }
 0x17b   : > { %v1133_v49 = vadd.f32 %v1128_v47, %v1031_v46 }
 0x17c   : > { %v1130_v50 = vpop.f32.mrf.mxu0 }
 0x17d   : > { %v1134_v51 = vadd.f32 %v1130_v50, %v1032_v48  ;;  %v1147_v52 = vmul.f32 %v1133_v49, %v1133_v49  ;;  %v1140_v54 = vsel %vm288_vm2, %v1133_v49, 0.0 }
 0x17f   : > { %v1137_v53 = vcombine.low %v1133_v49, %v1134_v51  ;;  %v1141_v55 = vsel %vm288_vm2, %v1134_v51, 0.0  ;;  %v1148_v56 = vmul.f32 %v1134_v51, %v1134_v51  ;;  %v1149_v58 = vsel %vm288_vm2, %v1147_v52, 0.0 }
 0x180   : > { %v1142_v57 = vadd.f32 %v1141_v55, %v1140_v54 }
 0x181   : > { %1139 = vst [vmem:[%s210_s26] sm:$0xff] %v1137_v53  ;;  %v1150_v59 = vsel %vm288_vm2, %v1148_v56, 0.0 }
 0x182   : > { %1143 = vadd.xlane.f32.xlu0 %v1142_v57  ;;  %v1151_v60 = vadd.f32 %v1150_v59, %v1149_v58 }
 0x184   : > { %1152 = vadd.xlane.f32.xlu1 %v1151_v60 }
 0x20b   : > { %v1144_v61 = vpop.xlane.xlu0 %1143 }
 0x20c   : > { %1146 = vst.msk [vmem:[%s214_s17] sm:$0xf] %vm1145_vm14, %v1144_v61 }
 0x20d   : > { %v1153_v62 = vpop.xlane.xlu1 %1152 }
 0x20e   : > { %1154 = vst.msk [vmem:[%s218_s6] sm:$0xf] %vm1145_vm14, %v1153_v62 }
 0x20f PF: > { %s15_s15 = sadd.s32 1, %s1347_s15  }
 0x210   : > { %p12_p4 = scmp.ge.s32.totalorder %s15_s15, 4  }
 0x212   :  { %14 = sbr.rel (!%p12_p4) target bundleno = 1 (0x1), region = 90 }

// kernel: residual_block_forward.3
= control target key start
LH: loop header
LB: loop body
LE: loop exit
PB: predicated region body
PF: predicated region fallthrough
CT: control target
= control target key end

     0   :  { %s1480_s21 = smov 0   ;;  %s1667_s0 = inlined_call_operand.vmem [shape: f32[2,4,256], index: 0, kind: input, shape index: {}]   ;;  %s1668_s1 = inlined_call_operand.vmem [shape: f32[4,1], index: 1, kind: input, shape index: {}]   ;;  %s1669_s2 = inlined_call_operand.vmem [shape: f32[4,1], index: 2, kind: input, shape index: {}]   ;;  %s1670_s3 = inlined_call_operand.vmem [shape: f32[9,4,4], index: 3, kind: input, shape index: {}]   ;;  %s1671_s4 = inlined_call_operand.vmem [shape: f32[2,4,256], index: 4, kind: output, shape index: {0}]   ;;  %s1672_s5 = inlined_call_operand.vmem [shape: f32[2,4,1], index: 5, kind: output, shape index: {1}]   ;;  %s1673_s6 = inlined_call_operand.vmem [shape: f32[2,4,1], index: 6, kind: output, shape index: {2}]  }
   0x1 LB: > { %s1355_s22 = sadd.s32 4294967295, %s1432_s21   ;;  %p1359_p0 = scmp.ge.s32.totalorder %s1432_s21, 1  ;;  %s1432_s21 = sphi %s1480_s21, %s17_s21  }
   0x2   : > { %p217_p1 = scmp.lt.s32.totalorder %s1432_s21, 3 }
   0x4   : > { %p218_p2 = pnand %p1359_p0, %p217_p1 }
   0x5   : > { %s1436_s27 = smov (!%p218_p2), 127   ;;  %s1437_s28 = smov (!%p218_p2), 113  }
   0x6   : > { %221 = sbr.rel (%p218_p2) target bundleno = 654 (0x28e), region = 36  ;;  %s1438_s29 = smov (!%p218_p2), 112  }
   0x7   : > { %p255_p3 = scmp.lt.s32.totalorder (!%p218_p2), %s1355_s22, 1  ;;  %s1440_s10 = smov (!%p218_p2), 16  }
   0x8   : > { %s1441_s11 = smov (!%p218_p2), 17   ;;  %s1442_s12 = smov (!%p218_p2), 15  }
   0x9   : > { %s1443_s13 = smov (!%p218_p2), 1   ;;  %s1444_s14 = smov (!%p218_p2), 111  }
   0xb   : > { %v274_v0 = vld [vmem:[%s1668_s1] sm:$0xf]  ;;  %v1434_v1 = vmov 0   ;;  %v1435_v2 = vmov 0.0   ;;  %v1439_v7 = vmov 839922192   ;;  %v282_v9 = vlaneseq }
   0xc   : > { %1424 = vset.pattern.permute.xlu0 %v1434_v1  ;;  %335 = vst [vmem:[#allocation2 + $0xc] sm:$0xf] %v1435_v2  ;;  %334 = vst [vmem:[#allocation2] sm:$0xf] %v1435_v2  ;;  %440 = vmatprep.mubr.f32.mxu0 %v1435_v2  ;;  %v288_v3 = vld [vmem:[%s1669_s2] sm:$0xf]  ;;  %v280_v8 = vunpack.c.l.s4 %v1439_v7 }
   0xd   : > { %277 = vperm.xlu0 %1424, %v274_v0   ;;  %520 = vmatprep.mubr.f32.mxu1 %v1435_v2  ;;  %s1683_s22 = smov (!%p255_p3, %s1355_s22), 1  ;;  %v283_v11 = vshrl.u32 %v282_v9, 7  ;;  %v304_v35 = vand.u32 127, %v282_v9  ;;  %vm348_vm0 = vcmask 138240   ;;  %vm371_vm3 = vcmask 1043456  }
   0xe   : > { %v281_v10 = vunpack.c.0.s8 %v280_v8  ;;  %s1403_s30 = sshll.u32 %s1683_s22, 3  ;;  %vm538_vm4 = vcmask 121856   ;;  %vm364_vm5 = vcmask 130048   ;;  %vm367_vm6 = vcmask 31744   ;;  %v355_v53 = vld [vmem:[%s1670_s3] sm:$0xf] }
   0xf   : > { %s259_s9 = scalar_lea.vmem %s1667_s0, %s1403_s30  ;;  %v305_v38 = vadd.s32 128, %v304_v35  ;;  %v310_v42 = vand.u32 15, %v304_v35  ;;  %v1366_v62 = vld [vmem:[%s1670_s3 + $0x4] sm:$0xf]  ;;  %vm640_vm9 = vcmask 7168   ;;  %vm827_vm10 = vcmask 1039360  }
  0x10   : > { %v284_v12 = vsub.s32 %v281_v10, %v283_v11  ;;  %v273_v15 = vld [vmem:[%s259_s9] sm:$0xff]  ;;  %vm1033_vm11 = vcmask 916480   ;;  %vm929_vm12 = vcmask 924672   ;;  %v1377_v11 = vld [vmem:[%s1670_s3 + $0xc] sm:$0xf]  ;;  %vm1127_vm13 = vcmask 908288  }
  0x11   : > { %291 = vperm.xlu0 %1424, %v288_v3   ;;  %v317_v41 = vand.u32 15, %v305_v38  ;;  %vm1540_vm2 = vcmp.ge.s32.totalorder %v310_v42, 1  ;;  %vm1557_vm8 = vcmp.le.s32.totalorder %v310_v42, 14  ;;  %s1364_s15 = sshll.u32 %s1683_s22, 2  ;;  %vm1228_vm14 = vcmask 3072  }
  0x12   : > { %s272_s20 = scalar_lea.vmem %s1673_s6, %s1364_s15 }
  0x13   : > { %v817_v4 = vld [vmem:[#allocation2 + $0xc] sm:$0xf]  ;;  %vm1536_vm1 = vcmp.ge.s32.totalorder %v317_v41, 1  ;;  %vm1552_vm7 = vcmp.le.s32.totalorder %v317_v41, 14 }
  0x14   : > { %v919_v5 = vld [vmem:[#allocation2 + $0xc] sm:$0xf]  ;;  %825 = vrot.lane.b32.xlu1 %v817_v4, %s1436_s27 }
  0x15   : > { %927 = vrot.lane.b32.xlu0 %v919_v5, %s1437_s28  ;;  %v1021_v6 = vld [vmem:[#allocation2 + $0xc] sm:$0xf] }
  0x16   : > { %v1117_v27 = vld [vmem:[#allocation2 + $0xc] sm:$0xf] }
  0x18   : > { %1031 = vrot.lane.b32.xlu1 %v1021_v6, %s1438_s29  ;;  %v1373_v6 = vld [vmem:[%s1670_s3 + $0x8] sm:$0xf] }
  0x86   : > { %v826_v28 = vpop.permute.xlu1 %825 }
  0x88   : > { %v278_v13 = vpop.permute.xlu0 %277 }
  0x89   : > { %v285_v14 = vrot.slane %v278_v13, %v284_v12 }
  0x8a   : > { %v1530_v29 = vpop.permute.xlu1 %1031 }
  0x8b   : > { %v287_v17 = vmul.f32 %v285_v14, %v273_v15 }
  0x8c   : > { %v292_v16 = vpop.permute.xlu0 %291 }
  0x8d   : > { %v299_v18 = vrot.slane %v292_v16, %v284_v12 }
  0x8f   : > { %v301_v19 = vadd.f32 %v299_v18, %v287_v17 }
  0x90   : > { %v1532_v30 = vpop.permute.xlu0 %927 }
  0x91   : > { %v1509_v20 = vmax.f32 %v301_v19, 0.0 }
  0x93   : > { %336 = vst [vmem:[#allocation2 + $0x4] sm:$0xff] %v1509_v20  ;;  %v1520_v26 = vcombine.high %v1509_v20, %v1509_v20 }
  0x9a   : > { %v338_v21 = vld [vmem:[#allocation2 + $0x8] sm:$0xf]  ;;  %v337_v22 = vld [vmem:[#allocation2] sm:$0xff] }
  0x9b   : > { %362 = vrot.lane.b32.xlu1 %v338_v21, %s1440_s10  ;;  %358 = vrot.lane.b32.xlu0 %v337_v22, %s1440_s10  ;;  %v630_v23 = vld [vmem:[#allocation2 + $0x8] sm:$0xf]  ;;  %v531_v25 = vcombine.high %v337_v22, %v337_v22 }
  0x9c   : > { %v528_v24 = vld [vmem:[#allocation2 + $0x8] sm:$0xf] }
  0x9f   : > { %346 = vrot.lane.b32.xlu1 %v338_v21, %s1441_s11  ;;  %532 = vrot.lane.b32.xlu0 %v337_v22, %s1442_s12  ;;  %v1381_v21 = vld [vmem:[%s1670_s3 + $0x10] sm:$0xf] }
  0xa3   : > { %342 = vrot.lane.b32.xlu1 %v337_v22, %s1441_s11  ;;  %638 = vrot.lane.b32.xlu0 %v630_v23, %s1443_s13 }
  0xa7   : > { %536 = vrot.lane.b32.xlu1 %v528_v24, %s1442_s12  ;;  %821 = vrot.lane.b32.xlu0 %v1509_v20, %s1436_s27 }
  0xab   : > { %634 = vrot.lane.b32.xlu1 %v337_v22, %s1443_s13  ;;  %1027 = vrot.lane.b32.xlu0 %v1509_v20, %s1438_s29  ;;  %v1385_v22 = vld [vmem:[%s1670_s3 + $0x14] sm:$0xf] }
  0xaf   : > { %923 = vrot.lane.b32.xlu1 %v1509_v20, %s1437_s28  ;;  %344 = vrot.lane.b32.xlu0 %v531_v25, %s1441_s11 }
  0xb3   : > { %534 = vrot.lane.b32.xlu0 %v531_v25, %s1442_s12  ;;  %360 = vrot.lane.b32.xlu1 %v531_v25, %s1440_s10 }
  0xb7   : > { %823 = vrot.lane.b32.xlu0 %v1520_v26, %s1436_s27  ;;  %636 = vrot.lane.b32.xlu1 %v531_v25, %s1443_s13 }
  0xbb   : > { %1029 = vrot.lane.b32.xlu0 %v1520_v26, %s1438_s29  ;;  %925 = vrot.lane.b32.xlu1 %v1520_v26, %s1437_s28 }
  0xbf   : > { %1125 = vrot.lane.b32.xlu0 %v1117_v27, %s1444_s14  ;;  %1123 = vrot.lane.b32.xlu1 %v1520_v26, %s1444_s14 }
  0xc3   : > { %1121 = vrot.lane.b32.xlu1 %v1509_v20, %s1444_s14  ;;  %s264_s14 = scalar_lea.vmem %s1671_s4, %s1403_s30  ;;  %s268_s30 = scalar_lea.vmem %s1672_s5, %s1364_s15 }
 0x10d   : > { %v363_v31 = vpop.permute.xlu1 %362  ;;  %v359_v32 = vpop.permute.xlu0 %358 }
 0x111   : > { %v347_v33 = vpop.permute.xlu1 %346  ;;  %v533_v34 = vpop.permute.xlu0 %532 }
 0x115   : > { %v343_v36 = vpop.permute.xlu1 %342  ;;  %v639_v37 = vpop.permute.xlu0 %638 }
 0x119   : > { %v537_v39 = vpop.permute.xlu1 %536  ;;  %v822_v40 = vpop.permute.xlu0 %821 }
 0x11d   : > { %v635_v43 = vpop.permute.xlu1 %634  ;;  %v1534_v44 = vpop.permute.xlu0 %1027 }
 0x121   : > { %v924_v47 = vpop.permute.xlu1 %923  ;;  %v345_v48 = vpop.permute.xlu0 %344 }
 0x122   : > { %v349_v49 = vsel %vm348_vm0, %v343_v36, %v345_v48  ;;  %v350_v50 = vsel %vm348_vm0, %v345_v48, %v347_v33  ;;  %v1397_v33 = vld [vmem:[%s1670_s3 + $0x20] sm:$0xf] }
 0x123   : > { %v354_v51 = vsel %vm1536_vm1, %v350_v50, 0.0  ;;  %v353_v52 = vsel %vm1540_vm2, %v349_v49, 0.0 }
 0x124   : > { %1370 = vmatprep.subr.msk.mxu1 %vm371_vm3, %v354_v51 }
 0x125   : > { %1371 = vmatpush1.msk.msra.mxu1 %vm371_vm3, %v353_v52  ;;  %v535_v56 = vpop.permute.xlu0 %534  ;;  %v361_v57 = vpop.permute.xlu1 %360 }
 0x126   : > { %v539_v58 = vsel %vm538_vm4, %v533_v34, %v535_v56  ;;  %v540_v59 = vsel %vm538_vm4, %v535_v56, %v537_v39  ;;  %v366_v60 = vsel %vm364_vm5, %v361_v57, %v363_v31  ;;  %v365_v61 = vsel %vm364_vm5, %v359_v32, %v361_v57  ;;  %1372 = vmatmul.mubr.msk.f32.vlgmr.msra.gmra.mxu1 %vm367_vm6, %v355_v53 }
 0x127   : > { %v544_v63 = vsel %vm1552_vm7, %v540_v59, 0.0  ;;  %1367 = vmatprep.subr.msk.mxu0 %vm371_vm3, %v366_v60  ;;  %722 = vmatprep.mubr.f32.mxu1 %v1435_v2  ;;  %v543_v0 = vsel %vm1557_vm8, %v539_v58, 0.0 }
 0x128   : > { %1368 = vmatpush1.msk.msra.mxu0 %vm371_vm3, %v365_v61 }
 0x129   : > { %v824_v1 = vpop.permute.xlu0 %823  ;;  %1369 = vmatmul.mubr.msk.f32.vlgmr.msra.gmra.mxu0 %vm367_vm6, %v1366_v62  ;;  %1374 = vmatprep.subr.msk.mxu0 %vm371_vm3, %v544_v63  ;;  %v637_v3 = vpop.permute.xlu1 %636 }
 0x12a   : > { %v641_v4 = vsel %vm640_vm9, %v635_v43, %v637_v3  ;;  %v642_v5 = vsel %vm640_vm9, %v637_v3, %v639_v37  ;;  %1375 = vmatpush1.msk.msra.mxu0 %vm371_vm3, %v543_v0  ;;  %v829_v7 = vsel %vm827_vm10, %v824_v1, %v826_v28  ;;  %620 = vmatprep.mubr.f32.mxu0 %v1435_v2  ;;  %v1389_v28 = vld [vmem:[%s1670_s3 + $0x18] sm:$0xf] }
 0x12b   : > { %v645_v8 = vsel %vm1540_vm2, %v641_v4, 0.0  ;;  %v646_v9 = vsel %vm1536_vm1, %v642_v5, 0.0  ;;  %1382 = vmatprep.subr.msk.mxu0 %vm371_vm3, %v1520_v26  ;;  %v828_v10 = vsel %vm827_vm10, %v822_v40, %v824_v1  ;;  %v833_v14 = vsel %vm1552_vm7, %v829_v7, 0.0 }
 0x12c   : > { %1378 = vmatprep.subr.msk.mxu1 %vm371_vm3, %v646_v9  ;;  %v832_v18 = vsel %vm1557_vm8, %v828_v10, 0.0 }
 0x12d   : > { %v1030_v12 = vpop.permute.xlu0 %1029  ;;  %1376 = vmatmul.mubr.msk.f32.vlgmr.msra.gmra.mxu0 %vm367_vm6, %v1373_v6  ;;  %1379 = vmatpush1.msk.msra.mxu1 %vm371_vm3, %v645_v8  ;;  %v926_v13 = vpop.permute.xlu1 %925 }
 0x12e   : > { %v1035_v15 = vsel %vm1033_vm11, %v1030_v12, %v1530_v29  ;;  %1383 = vmatpush1.msk.msra.mxu0 %vm371_vm3, %v1509_v20  ;;  %v930_v16 = vsel %vm929_vm12, %v924_v47, %v926_v13  ;;  %v931_v17 = vsel %vm929_vm12, %v926_v13, %v1532_v30  ;;  %1380 = vmatmul.mubr.msk.f32.vlgmr.msra.gmra.mxu1 %vm367_vm6, %v1377_v11  ;;  %v1393_v29 = vld [vmem:[%s1670_s3 + $0x1c] sm:$0xf] }
 0x12f   : > { %v935_v19 = vsel %vm1536_vm1, %v931_v17, 0.0  ;;  %1386 = vmatprep.subr.msk.mxu1 %vm371_vm3, %v833_v14  ;;  %v934_v20 = vsel %vm1540_vm2, %v930_v16, 0.0  ;;  %807 = vmatprep.mubr.f32.mxu0 %v1435_v2  ;;  %v1034_v26 = vsel %vm1033_vm11, %v1534_v44, %v1030_v12 }
 0x130   : > { %1387 = vmatpush1.msk.msra.mxu1 %vm371_vm3, %v832_v18  ;;  %1390 = vmatprep.subr.msk.mxu0 %vm371_vm3, %v935_v19 }
 0x131   : > { %1394 = vmatprep.subr.msk.mxu1 %vm371_vm3, %v1035_v15  ;;  %v1126_v23 = vpop.permute.xlu0 %1125  ;;  %v1124_v24 = vpop.permute.xlu1 %1123  ;;  %1384 = vmatmul.mubr.msk.f32.vlgmr.msra.gmra.mxu0 %vm367_vm6, %v1381_v21 }
 0x132   : > { %909 = vmatprep.mubr.f32.mxu1 %v1435_v2  ;;  %v1129_v25 = vsel %vm1127_vm13, %v1124_v24, %v1126_v23  ;;  %1391 = vmatpush1.msk.msra.mxu0 %vm371_vm3, %v934_v20 }
 0x133   : > { %v1133_v27 = vsel %vm1552_vm7, %v1129_v25, 0.0  ;;  %1388 = vmatmul.mubr.msk.f32.vlgmr.msra.gmra.mxu1 %vm367_vm6, %v1385_v22  ;;  %1011 = vmatprep.mubr.f32.mxu0 %v1435_v2 }
 0x134   : > { %1395 = vmatpush1.msk.msra.mxu1 %vm371_vm3, %v1034_v26  ;;  %1398 = vmatprep.subr.msk.mxu0 %vm371_vm3, %v1133_v27 }
 0x135   : > { %v1122_v30 = vpop.permute.xlu1 %1121  ;;  %1107 = vmatprep.mubr.f32.mxu1 %v1435_v2  ;;  %1392 = vmatmul.mubr.msk.f32.vlgmr.msra.gmra.mxu0 %vm367_vm6, %v1389_v28 }
 0x136   : > { %v1128_v31 = vsel %vm1127_vm13, %v1122_v30, %v1124_v24  ;;  %1209 = vmatprep.mubr.f32.mxu0 %v1435_v2 }
 0x137   : > { %v1132_v32 = vsel %vm1557_vm8, %v1128_v31, 0.0  ;;  %1396 = vmatmul.mubr.msk.f32.vlgmr.msra.gmra.mxu1 %vm367_vm6, %v1393_v29 }
 0x138   : > { %1399 = vmatpush1.msk.msra.mxu0 %vm371_vm3, %v1132_v32 }
 0x139   : > { %1400 = vmatmul.mubr.msk.f32.vlgmr.msra.gmra.mxu0 %vm367_vm6, %v1397_v33 }
 0x1e6   : > { %v522_v34 = vpop.f32.mrf.mxu1 }
 0x1e8   : > { %v524_v37 = vpop.f32.mrf.mxu1 }
 0x1e9   : > { %v442_v35 = vpop.f32.mrf.mxu0 }
 0x1ea   : > { %v523_v38 = vadd.f32 %v522_v34, %v442_v35 }
 0x1eb   : > { %v444_v36 = vpop.f32.mrf.mxu0 }
 0x1ec   : > { %v525_v40 = vadd.f32 %v524_v37, %v444_v36 }
 0x1ed   : > { %v622_v39 = vpop.f32.mrf.mxu0 }
 0x1ee   : > { %v627_v41 = vadd.f32 %v622_v39, %v523_v38  ;;  %v724_v43 = vpop.f32.mrf.mxu1 }
 0x1ef   : > { %v624_v42 = vpop.f32.mrf.mxu0 }
 0x1f0   : > { %v628_v44 = vadd.f32 %v624_v42, %v525_v40  ;;  %v729_v2 = vadd.f32 %v724_v43, %v627_v41  ;;  %v726_v45 = vpop.f32.mrf.mxu1 }
 0x1f1   : > { %v809_v47 = vpop.f32.mrf.mxu0 }
 0x1f2   : > { %v730_v46 = vadd.f32 %v726_v45, %v628_v44  ;;  %v814_v48 = vadd.f32 %v809_v47, %v729_v2 }
 0x1f3   : > { %v911_v49 = vpop.f32.mrf.mxu1  ;;  %v811_v50 = vpop.f32.mrf.mxu0 }
 0x1f4   : > { %v815_v51 = vadd.f32 %v811_v50, %v730_v46  ;;  %v916_v52 = vadd.f32 %v911_v49, %v814_v48 }
 0x1f5   : > { %v913_v53 = vpop.f32.mrf.mxu1  ;;  %v1013_v54 = vpop.f32.mrf.mxu0 }
 0x1f6   : > { %v917_v55 = vadd.f32 %v913_v53, %v815_v51  ;;  %v1018_v56 = vadd.f32 %v1013_v54, %v916_v52 }
 0x1f7   : > { %v1109_v57 = vpop.f32.mrf.mxu1  ;;  %v1015_v58 = vpop.f32.mrf.mxu0 }
 0x1f8   : > { %v1019_v59 = vadd.f32 %v1015_v58, %v917_v55  ;;  %v1114_v60 = vadd.f32 %v1109_v57, %v1018_v56 }
 0x1f9   : > { %v1111_v61 = vpop.f32.mrf.mxu1  ;;  %v1211_v62 = vpop.f32.mrf.mxu0 }
 0x1fa   : > { %v1115_v63 = vadd.f32 %v1111_v61, %v1019_v59  ;;  %v1216_v0 = vadd.f32 %v1211_v62, %v1114_v60 }
 0x1fb   : > { %v1213_v1 = vpop.f32.mrf.mxu0 }
 0x1fc   : > { %v1217_v3 = vadd.f32 %v1213_v1, %v1115_v63  ;;  %v1230_v4 = vmul.f32 %v1216_v0, %v1216_v0  ;;  %v1223_v6 = vsel %vm371_vm3, %v1216_v0, 0.0 }
 0x1fe   : > { %v1220_v5 = vcombine.low %v1216_v0, %v1217_v3  ;;  %v1224_v7 = vsel %vm371_vm3, %v1217_v3, 0.0  ;;  %v1231_v8 = vmul.f32 %v1217_v3, %v1217_v3  ;;  %v1232_v10 = vsel %vm371_vm3, %v1230_v4, 0.0 }
 0x1ff   : > { %v1225_v9 = vadd.f32 %v1224_v7, %v1223_v6 }
 0x200   : > { %1222 = vst [vmem:[%s264_s14] sm:$0xff] %v1220_v5  ;;  %v1233_v11 = vsel %vm371_vm3, %v1231_v8, 0.0 }
 0x201   : > { %1226 = vadd.xlane.f32.xlu0 %v1225_v9  ;;  %v1234_v12 = vadd.f32 %v1233_v11, %v1232_v10 }
 0x203   : > { %1235 = vadd.xlane.f32.xlu1 %v1234_v12 }
 0x28a   : > { %v1227_v13 = vpop.xlane.xlu0 %1226 }
 0x28b   : > { %1229 = vst.msk [vmem:[%s268_s30] sm:$0xf] %vm1228_vm14, %v1227_v13 }
 0x28c   : > { %v1236_v14 = vpop.xlane.xlu1 %1235 }
 0x28d   : > { %1237 = vst.msk [vmem:[%s272_s20] sm:$0xf] %vm1228_vm14, %v1236_v14 }
 0x28e PF: > { %s17_s21 = sadd.s32 1, %s1432_s21  }
 0x28f   : > { %p14_p4 = scmp.ge.s32.totalorder %s17_s21, 4  }
 0x291   :  { %16 = sbr.rel (!%p14_p4) target bundleno = 1 (0x1), region = 98 }

</bundles_post_ra>
